<compile_context>
chip_gen: v7x
topology: tpu7x:2x2x1
jax: 0.10.0
libtpu: 0.0.40
codegen_flags: <defaults>
</compile_context>

<pallas_src>
import jax
import jax.numpy as jnp
from jax.experimental import pallas as pl
from jax.experimental.pallas import tpu as pltpu

_EPS = 1e-5


def _downblock_kernel(x_ref, w1_ref, b1_ref, s1_ref, t1_ref,
                      w2_ref, b2_ref, s2_ref, t2_ref,
                      o_ref, pad1, pad2):
    # x_ref : (1, Hp, 2, Wp, 2*Cin)  one batch element; pooling rows on axis 2,
    #                                pooling columns interleaved into the channel dim
    # w*_ref: (9*Cin, Cout)          im2col conv weights (bf16)
    # b*/s*/t*_ref : (1, Cout)       conv bias / folded-BN scale / shift (f32)
    # o_ref : (1, Hp, Wp, Cout)
    # pad1  : VMEM (Hp+2, Wp+2, Cin)  f32 padded-activation scratch for conv1
    # pad2  : VMEM (Hp+2, Wp+2, Cout) f32 padded-activation scratch for conv2
    Hp, Wp, Cout = o_ref.shape[1], o_ref.shape[2], o_ref.shape[3]
    Cin = x_ref.shape[-1] // 2

    # ---- MaxPool2d(2), fully in-kernel (VPU maxima, no extra HBM pass) ----
    top = x_ref[0, :, 0, :, :]                 # rows 2h   : (Hp, Wp, 2*Cin)
    bot = x_ref[0, :, 1, :, :]                 # rows 2h+1 : (Hp, Wp, 2*Cin)
    rmax = jnp.maximum(top, bot)
    pooled = jnp.maximum(rmax[:, :, :Cin], rmax[:, :, Cin:])   # (Hp, Wp, Cin)

    def conv3x3_relu_bn(pad_ref, inp, w_ref, b_ref, s_ref, t_ref, cin):
        # Zero only the 1-pixel border; the interior is fully overwritten below.
        pad_ref[0:1, :, :] = jnp.zeros((1, Wp + 2, cin), jnp.float32)
        pad_ref[Hp + 1:Hp + 2, :, :] = jnp.zeros((1, Wp + 2, cin), jnp.float32)
        pad_ref[:, 0:1, :] = jnp.zeros((Hp + 2, 1, cin), jnp.float32)
        pad_ref[:, Wp + 1:Wp + 2, :] = jnp.zeros((Hp + 2, 1, cin), jnp.float32)
        pad_ref[1:Hp + 1, 1:Wp + 1, :] = inp

        # im2col: 9 shifted taps -> (Hp*Wp, 9*cin); one bf16 MXU matmul, f32 accum.
        taps = []
        for dy in range(3):
            for dx in range(3):
                taps.append(pad_ref[dy:dy + Hp, dx:dx + Wp, :].reshape(Hp * Wp, cin))
        patches = jnp.concatenate(taps, axis=1).astype(jnp.bfloat16)

        acc = jnp.dot(patches, w_ref[...],
                      preferred_element_type=jnp.float32)       # (Hp*Wp, Cout) f32
        acc = jnp.maximum(acc + b_ref[...], 0.0)                 # conv bias + ReLU
        return acc * s_ref[...] + t_ref[...]                     # eval-mode BatchNorm

    h1 = conv3x3_relu_bn(pad1, pooled, w1_ref, b1_ref, s1_ref, t1_ref, Cin)
    h2 = conv3x3_relu_bn(pad2, h1.reshape(Hp, Wp, Cout),
                         w2_ref, b2_ref, s2_ref, t2_ref, Cout)
    o_ref[0] = h2.reshape(Hp, Wp, Cout).astype(o_ref.dtype)


@jax.jit
def downblock_forward(x_nchw, params):
    (w1, b1, g1, be1, m1, v1, w2, b2, g2, be2, m2, v2) = params
    N, Cin, H, W = x_nchw.shape
    Cout = w1.shape[0]
    Hp, Wp = H // 2, W // 2

    # Single layout pass: NCHW -> NHWC.  The pooling-window split is a pure reshape
    # (bitcast) of the NHWC array, so it costs no extra HBM traffic.
    x = jnp.transpose(x_nchw, (0, 2, 3, 1)).astype(jnp.float32)
    x = x.reshape(N, Hp, 2, Wp, 2 * Cin)

    # PyTorch OIHW conv weights -> im2col (9*Cin, Cout), bf16 for the MXU.
    def im2col_w(w):
        return (jnp.transpose(w, (2, 3, 1, 0))
                .reshape(9 * w.shape[1], w.shape[0])
                .astype(jnp.bfloat16))
    w1_m = im2col_w(w1)
    w2_m = im2col_w(w2)

    # Fold eval-mode BN into per-channel scale / shift.
    s1 = g1 / jnp.sqrt(v1 + _EPS); t1 = be1 - m1 * s1
    s2 = g2 / jnp.sqrt(v2 + _EPS); t2 = be2 - m2 * s2

    def row(v):
        return v.reshape(1, -1).astype(jnp.float32)

    grid_spec = pltpu.PrefetchScalarGridSpec(
        num_scalar_prefetch=0,
        grid=(N,),
        in_specs=[
            pl.BlockSpec((1, Hp, 2, Wp, 2 * Cin), lambda n: (n, 0, 0, 0, 0)),
            pl.BlockSpec((9 * Cin, Cout), lambda n: (0, 0)),
            pl.BlockSpec((1, Cout), lambda n: (0, 0)),
            pl.BlockSpec((1, Cout), lambda n: (0, 0)),
            pl.BlockSpec((1, Cout), lambda n: (0, 0)),
            pl.BlockSpec((9 * Cout, Cout), lambda n: (0, 0)),
            pl.BlockSpec((1, Cout), lambda n: (0, 0)),
            pl.BlockSpec((1, Cout), lambda n: (0, 0)),
            pl.BlockSpec((1, Cout), lambda n: (0, 0)),
        ],
        out_specs=pl.BlockSpec((1, Hp, Wp, Cout), lambda n: (n, 0, 0, 0)),
        scratch_shapes=[pltpu.VMEM((Hp + 2, Wp + 2, Cin), jnp.float32),
                        pltpu.VMEM((Hp + 2, Wp + 2, Cout), jnp.float32)],
    )

    # Advisory cost hint for XLA's scheduler around the custom call.
    flops = 2 * N * Hp * Wp * 9 * (Cin * Cout + Cout * Cout)
    bytes_accessed = (N * Cin * H * W * 4              # pooled input (f32)
                      + N * Cout * Hp * Wp * 4         # output (f32)
                      + (9 * Cin * Cout + 9 * Cout * Cout) * 2   # bf16 weights
                      + 8 * Cout * 4)                  # bias / scale / shift rows
    cost = pl.CostEstimate(flops=flops, transcendentals=0,
                           bytes_accessed=bytes_accessed)

    out_nhwc = pl.pallas_call(
        _downblock_kernel,
        out_shape=jax.ShapeDtypeStruct((N, Hp, Wp, Cout), jnp.float32),
        grid_spec=grid_spec,
        compiler_params=pltpu.CompilerParams(
            dimension_semantics=("parallel",),
            vmem_limit_bytes=32 * 1024 * 1024),
        cost_estimate=cost,
    )(x, w1_m, row(b1), row(s1), row(t1), w2_m, row(b2), row(s2), row(t2))

    return jnp.transpose(out_nhwc, (0, 3, 1, 2))  # back to NCHW


def reference_forward(x_nchw, params):
    """Pure-JAX (XLA) reference matching the PyTorch forward (eval-mode BN)."""
    (w1, b1, g1, be1, m1, v1, w2, b2, g2, be2, m2, v2) = params
    N, C, H, W = x_nchw.shape
    xp = x_nchw.reshape(N, C, H // 2, 2, W // 2, 2).max(axis=(3, 5))   # MaxPool2d(2)

    def conv_relu_bn(x, w, b, g, beta, m, v):
        y = jax.lax.conv_general_dilated(
            x, w, window_strides=(1, 1), padding=((1, 1), (1, 1)),
            dimension_numbers=("NCHW", "OIHW", "NCHW"),
            precision=jax.lax.Precision.HIGHEST)
        y = y + b[None, :, None, None]
        y = jnp.maximum(y, 0.0)
        y = (y - m[None, :, None, None]) / jnp.sqrt(v[None, :, None, None] + _EPS)
        return y * g[None, :, None, None] + beta[None, :, None, None]

    y = conv_relu_bn(xp, w1, b1, g1, be1, m1, v1)
    y = conv_relu_bn(y, w2, b2, g2, be2, m2, v2)
    return y


if __name__ == "__main__":
    N, in_ch, out_ch, H, W = 2, 4, 8, 16, 16
    key = jax.random.PRNGKey(0)
    ks = jax.random.split(key, 14)

    x = jax.random.normal(ks[0], (N, in_ch, H, W), jnp.float32)

    # Deterministic synthetic parameters (PyTorch shapes: Conv2d OIHW, BN per-channel).
    w1 = 0.1 * jax.random.normal(ks[1], (out_ch, in_ch, 3, 3), jnp.float32)
    b1 = 0.1 * jax.random.normal(ks[2], (out_ch,), jnp.float32)
    g1 = 1.0 + 0.1 * jax.random.normal(ks[3], (out_ch,), jnp.float32)
    be1 = 0.1 * jax.random.normal(ks[4], (out_ch,), jnp.float32)
    m1 = 0.1 * jax.random.normal(ks[5], (out_ch,), jnp.float32)
    v1 = 1.0 + 0.1 * jnp.abs(jax.random.normal(ks[6], (out_ch,), jnp.float32))

    w2 = 0.1 * jax.random.normal(ks[7], (out_ch, out_ch, 3, 3), jnp.float32)
    b2 = 0.1 * jax.random.normal(ks[8], (out_ch,), jnp.float32)
    g2 = 1.0 + 0.1 * jax.random.normal(ks[9], (out_ch,), jnp.float32)
    be2 = 0.1 * jax.random.normal(ks[10], (out_ch,), jnp.float32)
    m2 = 0.1 * jax.random.normal(ks[11], (out_ch,), jnp.float32)
    v2 = 1.0 + 0.1 * jnp.abs(jax.random.normal(ks[12], (out_ch,), jnp.float32))

    params = (w1, b1, g1, be1, m1, v1, w2, b2, g2, be2, m2, v2)

    out = downblock_forward(x, params)
    out = jax.block_until_ready(out)

    assert out.shape == (N, out_ch, H // 2, W // 2), out.shape

    ref = reference_forward(x, params)
    if not bool(jnp.allclose(out, ref, atol=2e-2, rtol=2e-2)):
        raise AssertionError(
            f"mismatch: max abs err = {float(jnp.max(jnp.abs(out - ref)))}")

    print("KERNEL_OK")
</pallas_src>

<mosaic_0001>
module attributes {stable_mosaic.version = 11 : i64} {
  func.func @_downblock_kernel(%arg0: i32, %arg1: memref<1x8x2x8x8xf32, #tpu.memory_space<vmem>>, %arg2: memref<36x8xbf16, #tpu.memory_space<vmem>>, %arg3: memref<1x8xf32, #tpu.memory_space<vmem>>, %arg4: memref<1x8xf32, #tpu.memory_space<vmem>>, %arg5: memref<1x8xf32, #tpu.memory_space<vmem>>, %arg6: memref<72x8xbf16, #tpu.memory_space<vmem>>, %arg7: memref<1x8xf32, #tpu.memory_space<vmem>>, %arg8: memref<1x8xf32, #tpu.memory_space<vmem>>, %arg9: memref<1x8xf32, #tpu.memory_space<vmem>>, %arg10: memref<1x8x8x8xf32, #tpu.memory_space<vmem>>, %arg11: memref<10x10x4xf32, #tpu.memory_space<vmem>>, %arg12: memref<10x10x8xf32, #tpu.memory_space<vmem>>) attributes {dimension_semantics = [#tpu.dimension_semantics<parallel>], iteration_bounds = array<i64: 2>, scalar_prefetch = 0 : i64, scratch_operands = 2 : i64, tpu.core_type = #tpu.core_type<tc>, window_params = [{transform_indices = @transform_0, window_bounds = array<i64: 1, 8, 2, 8, 8>}, {pipeline_mode = #tpu.pipeline_mode<synchronous>, transform_indices = @transform_1, window_bounds = array<i64: 36, 8>}, {pipeline_mode = #tpu.pipeline_mode<synchronous>, transform_indices = @transform_2, window_bounds = array<i64: 1, 8>}, {pipeline_mode = #tpu.pipeline_mode<synchronous>, transform_indices = @transform_3, window_bounds = array<i64: 1, 8>}, {pipeline_mode = #tpu.pipeline_mode<synchronous>, transform_indices = @transform_4, window_bounds = array<i64: 1, 8>}, {pipeline_mode = #tpu.pipeline_mode<synchronous>, transform_indices = @transform_5, window_bounds = array<i64: 72, 8>}, {pipeline_mode = #tpu.pipeline_mode<synchronous>, transform_indices = @transform_6, window_bounds = array<i64: 1, 8>}, {pipeline_mode = #tpu.pipeline_mode<synchronous>, transform_indices = @transform_7, window_bounds = array<i64: 1, 8>}, {pipeline_mode = #tpu.pipeline_mode<synchronous>, transform_indices = @transform_8, window_bounds = array<i64: 1, 8>}, {transform_indices = @transform_9, window_bounds = array<i64: 1, 8, 8, 8>}]} {
    %c0 = arith.constant 0 : index
    %c0_0 = arith.constant 0 : index
    %c0_1 = arith.constant 0 : index
    %c0_2 = arith.constant 0 : index
    %c0_3 = arith.constant 0 : index
    %0 = vector.load %arg1[%c0, %c0_0, %c0_1, %c0_2, %c0_3] : memref<1x8x2x8x8xf32, #tpu.memory_space<vmem>>, vector<1x8x1x8x8xf32>
    %1 = vector.shape_cast %0 : vector<1x8x1x8x8xf32> to vector<8x8x8xf32>
    %c0_4 = arith.constant 0 : index
    %c0_5 = arith.constant 0 : index
    %c1 = arith.constant 1 : index
    %c0_6 = arith.constant 0 : index
    %c0_7 = arith.constant 0 : index
    %2 = vector.load %arg1[%c0_4, %c0_5, %c1, %c0_6, %c0_7] : memref<1x8x2x8x8xf32, #tpu.memory_space<vmem>>, vector<1x8x1x8x8xf32>
    %3 = vector.shape_cast %2 : vector<1x8x1x8x8xf32> to vector<8x8x8xf32>
    %4 = arith.maximumf %1, %3 : vector<8x8x8xf32>
    %5 = vector.extract_strided_slice %4 {offsets = [0, 0, 0], sizes = [8, 8, 4], strides = [1, 1, 1]} : vector<8x8x8xf32> to vector<8x8x4xf32>
    %6 = vector.extract_strided_slice %4 {offsets = [0, 0, 4], sizes = [8, 8, 4], strides = [1, 1, 1]} : vector<8x8x8xf32> to vector<8x8x4xf32>
    %7 = arith.maximumf %5, %6 : vector<8x8x4xf32>
    %cst = arith.constant 0.000000e+00 : f32
    %8 = vector.broadcast %cst : f32 to vector<1x10x4xf32>
    %c0_8 = arith.constant 0 : index
    %c0_9 = arith.constant 0 : index
    %c0_10 = arith.constant 0 : index
    %9 = vector.load %arg11[%c0_8, %c0_9, %c0_10] : memref<10x10x4xf32, #tpu.memory_space<vmem>>, vector<1x10x4xf32>
    tpu.vector_store %arg11[%c0_8, %c0_9, %c0_10], %8 {strides = array<i32>} : memref<10x10x4xf32, #tpu.memory_space<vmem>>, vector<1x10x4xf32>,
    %cst_11 = arith.constant 0.000000e+00 : f32
    %10 = vector.broadcast %cst_11 : f32 to vector<1x10x4xf32>
    %c9 = arith.constant 9 : index
    %c0_12 = arith.constant 0 : index
    %c0_13 = arith.constant 0 : index
    %11 = vector.load %arg11[%c9, %c0_12, %c0_13] : memref<10x10x4xf32, #tpu.memory_space<vmem>>, vector<1x10x4xf32>
    tpu.vector_store %arg11[%c9, %c0_12, %c0_13], %10 {strides = array<i32>} : memref<10x10x4xf32, #tpu.memory_space<vmem>>, vector<1x10x4xf32>,
    %cst_14 = arith.constant 0.000000e+00 : f32
    %12 = vector.broadcast %cst_14 : f32 to vector<10x1x4xf32>
    %c0_15 = arith.constant 0 : index
    %c0_16 = arith.constant 0 : index
    %c0_17 = arith.constant 0 : index
    %13 = vector.load %arg11[%c0_15, %c0_16, %c0_17] : memref<10x10x4xf32, #tpu.memory_space<vmem>>, vector<10x1x4xf32>
    tpu.vector_store %arg11[%c0_15, %c0_16, %c0_17], %12 {strides = array<i32>} : memref<10x10x4xf32, #tpu.memory_space<vmem>>, vector<10x1x4xf32>,
    %cst_18 = arith.constant 0.000000e+00 : f32
    %14 = vector.broadcast %cst_18 : f32 to vector<10x1x4xf32>
    %c0_19 = arith.constant 0 : index
    %c9_20 = arith.constant 9 : index
    %c0_21 = arith.constant 0 : index
    %15 = vector.load %arg11[%c0_19, %c9_20, %c0_21] : memref<10x10x4xf32, #tpu.memory_space<vmem>>, vector<10x1x4xf32>
    tpu.vector_store %arg11[%c0_19, %c9_20, %c0_21], %14 {strides = array<i32>} : memref<10x10x4xf32, #tpu.memory_space<vmem>>, vector<10x1x4xf32>,
    %c1_22 = arith.constant 1 : index
    %c1_23 = arith.constant 1 : index
    %c0_24 = arith.constant 0 : index
    %16 = vector.load %arg11[%c1_22, %c1_23, %c0_24] : memref<10x10x4xf32, #tpu.memory_space<vmem>>, vector<8x8x4xf32>
    tpu.vector_store %arg11[%c1_22, %c1_23, %c0_24], %7 {strides = array<i32>} : memref<10x10x4xf32, #tpu.memory_space<vmem>>, vector<8x8x4xf32>,
    %c0_25 = arith.constant 0 : index
    %c0_26 = arith.constant 0 : index
    %c0_27 = arith.constant 0 : index
    %17 = vector.load %arg11[%c0_25, %c0_26, %c0_27] : memref<10x10x4xf32, #tpu.memory_space<vmem>>, vector<8x8x4xf32>
    %18 = vector.shape_cast %17 : vector<8x8x4xf32> to vector<64x4xf32>
    %c0_28 = arith.constant 0 : index
    %c1_29 = arith.constant 1 : index
    %c0_30 = arith.constant 0 : index
    %19 = vector.load %arg11[%c0_28, %c1_29, %c0_30] : memref<10x10x4xf32, #tpu.memory_space<vmem>>, vector<8x8x4xf32>
    %20 = vector.shape_cast %19 : vector<8x8x4xf32> to vector<64x4xf32>
    %c0_31 = arith.constant 0 : index
    %c2 = arith.constant 2 : index
    %c0_32 = arith.constant 0 : index
    %21 = vector.load %arg11[%c0_31, %c2, %c0_32] : memref<10x10x4xf32, #tpu.memory_space<vmem>>, vector<8x8x4xf32>
    %22 = vector.shape_cast %21 : vector<8x8x4xf32> to vector<64x4xf32>
    %c1_33 = arith.constant 1 : index
    %c0_34 = arith.constant 0 : index
    %c0_35 = arith.constant 0 : index
    %23 = vector.load %arg11[%c1_33, %c0_34, %c0_35] : memref<10x10x4xf32, #tpu.memory_space<vmem>>, vector<8x8x4xf32>
    %24 = vector.shape_cast %23 : vector<8x8x4xf32> to vector<64x4xf32>
    %c1_36 = arith.constant 1 : index
    %c1_37 = arith.constant 1 : index
    %c0_38 = arith.constant 0 : index
    %25 = vector.load %arg11[%c1_36, %c1_37, %c0_38] : memref<10x10x4xf32, #tpu.memory_space<vmem>>, vector<8x8x4xf32>
    %26 = vector.shape_cast %25 : vector<8x8x4xf32> to vector<64x4xf32>
    %c1_39 = arith.constant 1 : index
    %c2_40 = arith.constant 2 : index
    %c0_41 = arith.constant 0 : index
    %27 = vector.load %arg11[%c1_39, %c2_40, %c0_41] : memref<10x10x4xf32, #tpu.memory_space<vmem>>, vector<8x8x4xf32>
    %28 = vector.shape_cast %27 : vector<8x8x4xf32> to vector<64x4xf32>
    %c2_42 = arith.constant 2 : index
    %c0_43 = arith.constant 0 : index
    %c0_44 = arith.constant 0 : index
    %29 = vector.load %arg11[%c2_42, %c0_43, %c0_44] : memref<10x10x4xf32, #tpu.memory_space<vmem>>, vector<8x8x4xf32>
    %30 = vector.shape_cast %29 : vector<8x8x4xf32> to vector<64x4xf32>
    %c2_45 = arith.constant 2 : index
    %c1_46 = arith.constant 1 : index
    %c0_47 = arith.constant 0 : index
    %31 = vector.load %arg11[%c2_45, %c1_46, %c0_47] : memref<10x10x4xf32, #tpu.memory_space<vmem>>, vector<8x8x4xf32>
    %32 = vector.shape_cast %31 : vector<8x8x4xf32> to vector<64x4xf32>
    %c2_48 = arith.constant 2 : index
    %c2_49 = arith.constant 2 : index
    %c0_50 = arith.constant 0 : index
    %33 = vector.load %arg11[%c2_48, %c2_49, %c0_50] : memref<10x10x4xf32, #tpu.memory_space<vmem>>, vector<8x8x4xf32>
    %34 = vector.shape_cast %33 : vector<8x8x4xf32> to vector<64x4xf32>
    %35 = tpu.concatenate %18, %20, %22, %24, %26, %28, %30, %32, %34 in 1 : vector<64x4xf32>, vector<64x4xf32>, vector<64x4xf32>, vector<64x4xf32>, vector<64x4xf32>, vector<64x4xf32>, vector<64x4xf32>, vector<64x4xf32>, vector<64x4xf32> -> vector<64x36xf32>
    %36 = arith.truncf %35 : vector<64x36xf32> to vector<64x36xbf16>
    %c0_51 = arith.constant 0 : index
    %c0_52 = arith.constant 0 : index
    %37 = vector.load %arg2[%c0_51, %c0_52] : memref<36x8xbf16, #tpu.memory_space<vmem>>, vector<36x8xbf16>
    %cst_53 = arith.constant dense<0.000000e+00> : vector<64x8xf32>
    %38 = tpu.matmul %36, %37, %cst_53 {dimension_numbers = #tpu.dot_dimension_numbers<[1], [0], [0], [1], [0, 0, 1, 1], [], []>} : vector<64x36xbf16>, vector<36x8xbf16>, vector<64x8xf32> -> vector<64x8xf32>
    %c0_54 = arith.constant 0 : index
    %c0_55 = arith.constant 0 : index
    %39 = vector.load %arg3[%c0_54, %c0_55] : memref<1x8xf32, #tpu.memory_space<vmem>>, vector<1x8xf32>
    %40 = vector.broadcast %39 : vector<1x8xf32> to vector<64x8xf32>
    %41 = arith.addf %38, %40 : vector<64x8xf32>
    %cst_56 = arith.constant 0.000000e+00 : f32
    %42 = vector.broadcast %cst_56 : f32 to vector<64x8xf32>
    %43 = arith.maximumf %41, %42 : vector<64x8xf32>
    %c0_57 = arith.constant 0 : index
    %c0_58 = arith.constant 0 : index
    %44 = vector.load %arg4[%c0_57, %c0_58] : memref<1x8xf32, #tpu.memory_space<vmem>>, vector<1x8xf32>
    %45 = vector.broadcast %44 : vector<1x8xf32> to vector<64x8xf32>
    %46 = arith.mulf %43, %45 : vector<64x8xf32>
    %c0_59 = arith.constant 0 : index
    %c0_60 = arith.constant 0 : index
    %47 = vector.load %arg5[%c0_59, %c0_60] : memref<1x8xf32, #tpu.memory_space<vmem>>, vector<1x8xf32>
    %48 = vector.broadcast %47 : vector<1x8xf32> to vector<64x8xf32>
    %49 = arith.addf %46, %48 : vector<64x8xf32>
    %50 = vector.shape_cast %49 : vector<64x8xf32> to vector<8x8x8xf32>
    %cst_61 = arith.constant 0.000000e+00 : f32
    %51 = vector.broadcast %cst_61 : f32 to vector<1x10x8xf32>
    %c0_62 = arith.constant 0 : index
    %c0_63 = arith.constant 0 : index
    %c0_64 = arith.constant 0 : index
    %52 = vector.load %arg12[%c0_62, %c0_63, %c0_64] : memref<10x10x8xf32, #tpu.memory_space<vmem>>, vector<1x10x8xf32>
    tpu.vector_store %arg12[%c0_62, %c0_63, %c0_64], %51 {strides = array<i32>} : memref<10x10x8xf32, #tpu.memory_space<vmem>>, vector<1x10x8xf32>,
    %cst_65 = arith.constant 0.000000e+00 : f32
    %53 = vector.broadcast %cst_65 : f32 to vector<1x10x8xf32>
    %c9_66 = arith.constant 9 : index
    %c0_67 = arith.constant 0 : index
    %c0_68 = arith.constant 0 : index
    %54 = vector.load %arg12[%c9_66, %c0_67, %c0_68] : memref<10x10x8xf32, #tpu.memory_space<vmem>>, vector<1x10x8xf32>
    tpu.vector_store %arg12[%c9_66, %c0_67, %c0_68], %53 {strides = array<i32>} : memref<10x10x8xf32, #tpu.memory_space<vmem>>, vector<1x10x8xf32>,
    %cst_69 = arith.constant 0.000000e+00 : f32
    %55 = vector.broadcast %cst_69 : f32 to vector<10x1x8xf32>
    %c0_70 = arith.constant 0 : index
    %c0_71 = arith.constant 0 : index
    %c0_72 = arith.constant 0 : index
    %56 = vector.load %arg12[%c0_70, %c0_71, %c0_72] : memref<10x10x8xf32, #tpu.memory_space<vmem>>, vector<10x1x8xf32>
    tpu.vector_store %arg12[%c0_70, %c0_71, %c0_72], %55 {strides = array<i32>} : memref<10x10x8xf32, #tpu.memory_space<vmem>>, vector<10x1x8xf32>,
    %cst_73 = arith.constant 0.000000e+00 : f32
    %57 = vector.broadcast %cst_73 : f32 to vector<10x1x8xf32>
    %c0_74 = arith.constant 0 : index
    %c9_75 = arith.constant 9 : index
    %c0_76 = arith.constant 0 : index
    %58 = vector.load %arg12[%c0_74, %c9_75, %c0_76] : memref<10x10x8xf32, #tpu.memory_space<vmem>>, vector<10x1x8xf32>
    tpu.vector_store %arg12[%c0_74, %c9_75, %c0_76], %57 {strides = array<i32>} : memref<10x10x8xf32, #tpu.memory_space<vmem>>, vector<10x1x8xf32>,
    %c1_77 = arith.constant 1 : index
    %c1_78 = arith.constant 1 : index
    %c0_79 = arith.constant 0 : index
    %59 = vector.load %arg12[%c1_77, %c1_78, %c0_79] : memref<10x10x8xf32, #tpu.memory_space<vmem>>, vector<8x8x8xf32>
    tpu.vector_store %arg12[%c1_77, %c1_78, %c0_79], %50 {strides = array<i32>} : memref<10x10x8xf32, #tpu.memory_space<vmem>>, vector<8x8x8xf32>,
    %c0_80 = arith.constant 0 : index
    %c0_81 = arith.constant 0 : index
    %c0_82 = arith.constant 0 : index
    %60 = vector.load %arg12[%c0_80, %c0_81, %c0_82] : memref<10x10x8xf32, #tpu.memory_space<vmem>>, vector<8x8x8xf32>
    %61 = vector.shape_cast %60 : vector<8x8x8xf32> to vector<64x8xf32>
    %c0_83 = arith.constant 0 : index
    %c1_84 = arith.constant 1 : index
    %c0_85 = arith.constant 0 : index
    %62 = vector.load %arg12[%c0_83, %c1_84, %c0_85] : memref<10x10x8xf32, #tpu.memory_space<vmem>>, vector<8x8x8xf32>
    %63 = vector.shape_cast %62 : vector<8x8x8xf32> to vector<64x8xf32>
    %c0_86 = arith.constant 0 : index
    %c2_87 = arith.constant 2 : index
    %c0_88 = arith.constant 0 : index
    %64 = vector.load %arg12[%c0_86, %c2_87, %c0_88] : memref<10x10x8xf32, #tpu.memory_space<vmem>>, vector<8x8x8xf32>
    %65 = vector.shape_cast %64 : vector<8x8x8xf32> to vector<64x8xf32>
    %c1_89 = arith.constant 1 : index
    %c0_90 = arith.constant 0 : index
    %c0_91 = arith.constant 0 : index
    %66 = vector.load %arg12[%c1_89, %c0_90, %c0_91] : memref<10x10x8xf32, #tpu.memory_space<vmem>>, vector<8x8x8xf32>
    %67 = vector.shape_cast %66 : vector<8x8x8xf32> to vector<64x8xf32>
    %c1_92 = arith.constant 1 : index
    %c1_93 = arith.constant 1 : index
    %c0_94 = arith.constant 0 : index
    %68 = vector.load %arg12[%c1_92, %c1_93, %c0_94] : memref<10x10x8xf32, #tpu.memory_space<vmem>>, vector<8x8x8xf32>
    %69 = vector.shape_cast %68 : vector<8x8x8xf32> to vector<64x8xf32>
    %c1_95 = arith.constant 1 : index
    %c2_96 = arith.constant 2 : index
    %c0_97 = arith.constant 0 : index
    %70 = vector.load %arg12[%c1_95, %c2_96, %c0_97] : memref<10x10x8xf32, #tpu.memory_space<vmem>>, vector<8x8x8xf32>
    %71 = vector.shape_cast %70 : vector<8x8x8xf32> to vector<64x8xf32>
    %c2_98 = arith.constant 2 : index
    %c0_99 = arith.constant 0 : index
    %c0_100 = arith.constant 0 : index
    %72 = vector.load %arg12[%c2_98, %c0_99, %c0_100] : memref<10x10x8xf32, #tpu.memory_space<vmem>>, vector<8x8x8xf32>
    %73 = vector.shape_cast %72 : vector<8x8x8xf32> to vector<64x8xf32>
    %c2_101 = arith.constant 2 : index
    %c1_102 = arith.constant 1 : index
    %c0_103 = arith.constant 0 : index
    %74 = vector.load %arg12[%c2_101, %c1_102, %c0_103] : memref<10x10x8xf32, #tpu.memory_space<vmem>>, vector<8x8x8xf32>
    %75 = vector.shape_cast %74 : vector<8x8x8xf32> to vector<64x8xf32>
    %c2_104 = arith.constant 2 : index
    %c2_105 = arith.constant 2 : index
    %c0_106 = arith.constant 0 : index
    %76 = vector.load %arg12[%c2_104, %c2_105, %c0_106] : memref<10x10x8xf32, #tpu.memory_space<vmem>>, vector<8x8x8xf32>
    %77 = vector.shape_cast %76 : vector<8x8x8xf32> to vector<64x8xf32>
    %78 = tpu.concatenate %61, %63, %65, %67, %69, %71, %73, %75, %77 in 1 : vector<64x8xf32>, vector<64x8xf32>, vector<64x8xf32>, vector<64x8xf32>, vector<64x8xf32>, vector<64x8xf32>, vector<64x8xf32>, vector<64x8xf32>, vector<64x8xf32> -> vector<64x72xf32>
    %79 = arith.truncf %78 : vector<64x72xf32> to vector<64x72xbf16>
    %c0_107 = arith.constant 0 : index
    %c0_108 = arith.constant 0 : index
    %80 = vector.load %arg6[%c0_107, %c0_108] : memref<72x8xbf16, #tpu.memory_space<vmem>>, vector<72x8xbf16>
    %cst_109 = arith.constant dense<0.000000e+00> : vector<64x8xf32>
    %81 = tpu.matmul %79, %80, %cst_109 {dimension_numbers = #tpu.dot_dimension_numbers<[1], [0], [0], [1], [0, 0, 1, 1], [], []>} : vector<64x72xbf16>, vector<72x8xbf16>, vector<64x8xf32> -> vector<64x8xf32>
    %c0_110 = arith.constant 0 : index
    %c0_111 = arith.constant 0 : index
    %82 = vector.load %arg7[%c0_110, %c0_111] : memref<1x8xf32, #tpu.memory_space<vmem>>, vector<1x8xf32>
    %83 = vector.broadcast %82 : vector<1x8xf32> to vector<64x8xf32>
    %84 = arith.addf %81, %83 : vector<64x8xf32>
    %cst_112 = arith.constant 0.000000e+00 : f32
    %85 = vector.broadcast %cst_112 : f32 to vector<64x8xf32>
    %86 = arith.maximumf %84, %85 : vector<64x8xf32>
    %c0_113 = arith.constant 0 : index
    %c0_114 = arith.constant 0 : index
    %87 = vector.load %arg8[%c0_113, %c0_114] : memref<1x8xf32, #tpu.memory_space<vmem>>, vector<1x8xf32>
    %88 = vector.broadcast %87 : vector<1x8xf32> to vector<64x8xf32>
    %89 = arith.mulf %86, %88 : vector<64x8xf32>
    %c0_115 = arith.constant 0 : index
    %c0_116 = arith.constant 0 : index
    %90 = vector.load %arg9[%c0_115, %c0_116] : memref<1x8xf32, #tpu.memory_space<vmem>>, vector<1x8xf32>
    %91 = vector.broadcast %90 : vector<1x8xf32> to vector<64x8xf32>
    %92 = arith.addf %89, %91 : vector<64x8xf32>
    %93 = vector.shape_cast %92 : vector<64x8xf32> to vector<8x8x8xf32>
    %c0_117 = arith.constant 0 : index
    %c0_118 = arith.constant 0 : index
    %c0_119 = arith.constant 0 : index
    %c0_120 = arith.constant 0 : index
    %94 = vector.load %arg10[%c0_117, %c0_118, %c0_119, %c0_120] : memref<1x8x8x8xf32, #tpu.memory_space<vmem>>, vector<1x8x8x8xf32>
    %95 = vector.shape_cast %94 : vector<1x8x8x8xf32> to vector<8x8x8xf32>
    %96 = vector.shape_cast %93 : vector<8x8x8xf32> to vector<1x8x8x8xf32>
    tpu.vector_store %arg10[%c0_117, %c0_118, %c0_119, %c0_120], %96 {strides = array<i32>} : memref<1x8x8x8xf32, #tpu.memory_space<vmem>>, vector<1x8x8x8xf32>,
    return
  }
  func.func @transform_0(%arg0: i32) -> (i32, i32, i32, i32, i32) {
    %c0_i32 = arith.constant 0 : i32
    %c0_i32_0 = arith.constant 0 : i32
    %c0_i32_1 = arith.constant 0 : i32
    %c0_i32_2 = arith.constant 0 : i32
    %c0_i32_3 = arith.constant 0 : i32
    return %arg0, %c0_i32, %c0_i32_0, %c0_i32_1, %c0_i32_2 : i32, i32, i32, i32, i32
  }
  func.func @transform_1(%arg0: i32) -> (i32, i32) {
    %c0_i32 = arith.constant 0 : i32
    %c0_i32_0 = arith.constant 0 : i32
    %c0_i32_1 = arith.constant 0 : i32
    return %c0_i32, %c0_i32_0 : i32, i32
  }
  func.func @transform_2(%arg0: i32) -> (i32, i32) {
    %c0_i32 = arith.constant 0 : i32
    %c0_i32_0 = arith.constant 0 : i32
    %c0_i32_1 = arith.constant 0 : i32
    return %c0_i32, %c0_i32_0 : i32, i32
  }
  func.func @transform_3(%arg0: i32) -> (i32, i32) {
    %c0_i32 = arith.constant 0 : i32
    %c0_i32_0 = arith.constant 0 : i32
    %c0_i32_1 = arith.constant 0 : i32
    return %c0_i32, %c0_i32_0 : i32, i32
  }
  func.func @transform_4(%arg0: i32) -> (i32, i32) {
    %c0_i32 = arith.constant 0 : i32
    %c0_i32_0 = arith.constant 0 : i32
    %c0_i32_1 = arith.constant 0 : i32
    return %c0_i32, %c0_i32_0 : i32, i32
  }
  func.func @transform_5(%arg0: i32) -> (i32, i32) {
    %c0_i32 = arith.constant 0 : i32
    %c0_i32_0 = arith.constant 0 : i32
    %c0_i32_1 = arith.constant 0 : i32
    return %c0_i32, %c0_i32_0 : i32, i32
  }
  func.func @transform_6(%arg0: i32) -> (i32, i32) {
    %c0_i32 = arith.constant 0 : i32
    %c0_i32_0 = arith.constant 0 : i32
    %c0_i32_1 = arith.constant 0 : i32
    return %c0_i32, %c0_i32_0 : i32, i32
  }
  func.func @transform_7(%arg0: i32) -> (i32, i32) {
    %c0_i32 = arith.constant 0 : i32
    %c0_i32_0 = arith.constant 0 : i32
    %c0_i32_1 = arith.constant 0 : i32
    return %c0_i32, %c0_i32_0 : i32, i32
  }
  func.func @transform_8(%arg0: i32) -> (i32, i32) {
    %c0_i32 = arith.constant 0 : i32
    %c0_i32_0 = arith.constant 0 : i32
    %c0_i32_1 = arith.constant 0 : i32
    return %c0_i32, %c0_i32_0 : i32, i32
  }
  func.func @transform_9(%arg0: i32) -> (i32, i32, i32, i32) {
    %c0_i32 = arith.constant 0 : i32
    %c0_i32_0 = arith.constant 0 : i32
    %c0_i32_1 = arith.constant 0 : i32
    %c0_i32_2 = arith.constant 0 : i32
    return %arg0, %c0_i32, %c0_i32_0, %c0_i32_1 : i32, i32, i32, i32
  }
}

</mosaic_0001>

<bundles_post_ra>
// kernel: downblock_forward.1
= control target key start
LH: loop header
LB: loop body
LE: loop exit
PB: predicated region body
PF: predicated region fallthrough
CT: control target
= control target key end

     0   :  { %s2165_s30 = smov 0   ;;  %s2686_s0 = inlined_call_operand.vmem [shape: f32[2,8,2,8,8], index: 0, kind: input, shape index: {}]   ;;  %s2687_s1 = inlined_call_operand.vmem [shape: bf16[36,8], index: 1, kind: input, shape index: {}]   ;;  %s2688_s2 = inlined_call_operand.vmem [shape: f32[1,8], index: 2, kind: input, shape index: {}]   ;;  %s2689_s3 = inlined_call_operand.vmem [shape: f32[1,8], index: 3, kind: input, shape index: {}]   ;;  %s2690_s4 = inlined_call_operand.vmem [shape: f32[1,8], index: 4, kind: input, shape index: {}]   ;;  %s2691_s5 = inlined_call_operand.vmem [shape: bf16[72,8], index: 5, kind: input, shape index: {}]   ;;  %s2692_s6 = inlined_call_operand.vmem [shape: f32[1,8], index: 6, kind: input, shape index: {}]   ;;  %s2693_s7 = inlined_call_operand.vmem [shape: f32[1,8], index: 7, kind: input, shape index: {}]   ;;  %s2694_s8 = inlined_call_operand.vmem [shape: f32[1,8], index: 8, kind: input, shape index: {}]   ;;  %s2695_s9 = inlined_call_operand.vmem [shape: f32[2,8,8,8], index: 9, kind: output, shape index: {}]  }
   0x1 LB: > { %s1650_s10 = sadd.s32 4294967295, %s2099_s30   ;;  %p1654_p0 = scmp.ge.s32.totalorder %s2099_s30, 1  ;;  %s2099_s30 = sphi %s2165_s30, %s19_s30  }
   0x2   : > { %p287_p1 = scmp.lt.s32.totalorder %s2099_s30, 3 }
   0x4   : > { %p288_p2 = pnand %p1654_p0, %p287_p1 }
   0x5   : > { %p2175_p3 = scmp.lt.s32.totalorder (!%p288_p2), %s1650_s10, 1  ;;  %vm399_vm0 = vcmask (!%p288_p2), 31744   ;;  %vm401_vm1 = vcmask (!%p288_p2), 25600   ;;  %vm406_vm2 = vcmask (!%p288_p2), 24576   ;;  %v2101_v0 = vmov (!%p288_p2), 0.0   ;;  %s2102_s16 = smov (!%p288_p2), 124  }
   0x6   : > { %291 = sbr.rel (%p288_p2) target bundleno = 946 (0x3b2), region = 56  ;;  %400 = vst.msk [vmem:[#allocation2] sm:$0xff] (!%p288_p2), %vm399_vm0, %v2101_v0  ;;  %404 = vst.msk [vmem:[#allocation2 + $0x90] sm:$0xff] (!%p288_p2), %vm399_vm0, %v2101_v0  ;;  %vm773_vm3 = vcmask (!%p288_p2), 64512   ;;  %s2103_s17 = smov (!%p288_p2), 4   ;;  %v2085_v61 = vld [vmem:[%s2687_s1] sm:$0xff] (!%p288_p2)  }
   0x7   : > { %402 = vst.msk [vmem:[#allocation2 + $0x8] sm:$0x3] (!%p288_p2), %vm401_vm1, %v2101_v0  ;;  %405 = vst.msk [vmem:[#allocation2 + $0x98] sm:$0x3] (!%p288_p2), %vm401_vm1, %v2101_v0  ;;  %s2104_s18 = smov (!%p288_p2), 8   ;;  %s2105_s19 = smov (!%p288_p2), 12   ;;  %1709 = vmatprep.subr.bf16.mxu0 (!%p288_p2), %v2085_v61 }
   0x8   : > { %418 = vst.msk [vmem:[#allocation2 + $0x19] sm:$0x1] (!%p288_p2), %vm406_vm2, %v2101_v0  ;;  %408 = vst.msk [vmem:[#allocation2 + $0x10] sm:$0x1] (!%p288_p2), %vm406_vm2, %v2101_v0  ;;  %s2106_s22 = smov (!%p288_p2), 16   ;;  %1710 = vmatpush3.bf16.msra.mxu0 (!%p288_p2), %v2085_v61  ;;  %s2107_s25 = smov (!%p288_p2), 20  }
   0x9   : > { %409 = vst.msk [vmem:[#allocation2 + $0x20] sm:$0x1] (!%p288_p2), %vm406_vm2, %v2101_v0  ;;  %410 = vst.msk [vmem:[#allocation2 + $0x30] sm:$0x1] (!%p288_p2), %vm406_vm2, %v2101_v0  ;;  %s2108_s28 = smov (!%p288_p2), 24   ;;  %vm880_vm4 = vcmask (!%p288_p2), 1041408  }
   0xa   : > { %411 = vst.msk [vmem:[#allocation2 + $0x40] sm:$0x1] (!%p288_p2), %vm406_vm2, %v2101_v0  ;;  %412 = vst.msk [vmem:[#allocation2 + $0x50] sm:$0x1] (!%p288_p2), %vm406_vm2, %v2101_v0  ;;  %s2109_s29 = smov (!%p288_p2), 28   ;;  %s2110_s11 = smov (!%p288_p2), 32  }
   0xb   : > { %413 = vst.msk [vmem:[#allocation2 + $0x60] sm:$0x1] (!%p288_p2), %vm406_vm2, %v2101_v0  ;;  %414 = vst.msk [vmem:[#allocation2 + $0x70] sm:$0x1] (!%p288_p2), %vm406_vm2, %v2101_v0  ;;  %vm782_vm5 = vcmask (!%p288_p2), 97280   ;;  %vm791_vm6 = vcmask (!%p288_p2), 130048  }
   0xc   : > { %415 = vst.msk [vmem:[#allocation2 + $0x80] sm:$0x1] (!%p288_p2), %vm406_vm2, %v2101_v0  ;;  %419 = vst.msk [vmem:[#allocation2 + $0x29] sm:$0x1] (!%p288_p2), %vm406_vm2, %v2101_v0  ;;  %vm800_vm7 = vcmask (!%p288_p2), 162816   ;;  %vm809_vm8 = vcmask (!%p288_p2), 195584  }
   0xd   : > { %420 = vst.msk [vmem:[#allocation2 + $0x39] sm:$0x1] %vm406_vm2, %v2101_v0  ;;  %421 = vst.msk [vmem:[#allocation2 + $0x49] sm:$0x1] %vm406_vm2, %v2101_v0  ;;  %s2698_s10 = smov (!%p2175_p3, %s1650_s10), 1  ;;  %vm818_vm9 = vcmask 228352  }
   0xe   : > { %422 = vst.msk [vmem:[#allocation2 + $0x59] sm:$0x1] %vm406_vm2, %v2101_v0  ;;  %423 = vst.msk [vmem:[#allocation2 + $0x69] sm:$0x1] %vm406_vm2, %v2101_v0  ;;  %s1691_s12 = sshll.u32 %s2698_s10, 7  ;;  %v444_v35 = vld [vmem:[#allocation2 + $0x1] sm:$0xff] }
   0xf   : > { %424 = vst.msk [vmem:[#allocation2 + $0x79] sm:$0x1] %vm406_vm2, %v2101_v0  ;;  %425 = vst.msk [vmem:[#allocation2 + $0x89] sm:$0x1] %vm406_vm2, %v2101_v0  ;;  %s327_s15 = scalar_lea.vmem %s2686_s0, %s1691_s12  ;;  %vm827_vm10 = vcmask 261120   ;;  %vm867_vm11 = vcmask 293888  }
  0x10   : > { %417 = vst.msk [vmem:[#allocation2 + $0x9] sm:$0x1] %vm406_vm2, %v2101_v0  ;;  %407 = vst.msk [vmem:[#allocation2] sm:$0x1] %vm406_vm2, %v2101_v0  ;;  %v336_v1 = vld [vmem:[%s327_s15 + $0x20] sm:$0xff]  ;;  %v1661_v2 = vld [vmem:[%s327_s15 + $0x28] sm:$0xff] }
  0x11   : > { %416 = vst.msk [vmem:[#allocation2 + $0x90] sm:$0x1] %vm406_vm2, %v2101_v0  ;;  %426 = vst.msk [vmem:[#allocation2 + $0x99] sm:$0x1] %vm406_vm2, %v2101_v0  ;;  %v334_v3 = vld [vmem:[%s327_s15] sm:$0xff]  ;;  %v353_v4 = vmax.f32 %v336_v1, %v1661_v2  ;;  %v1659_v5 = vld [vmem:[%s327_s15 + $0x8] sm:$0xff] }
  0x12   : > { %v337_v6 = vld [vmem:[%s327_s15 + $0x30] sm:$0xff]  ;;  %v1662_v7 = vld [vmem:[%s327_s15 + $0x38] sm:$0xff]  ;;  %v351_v8 = vmax.f32 %v334_v3, %v1659_v5  ;;  %v338_v15 = vld [vmem:[%s327_s15 + $0x40] sm:$0xff]  ;;  %987 = vst.msk [vmem:[#allocation3] sm:$0xff] %vm773_vm3, %v2101_v0  ;;  %vm988_vm12 = vcmask 58368   ;;  %vm993_vm13 = vcmask 57344  }
  0x13   : > { %v335_v9 = vld [vmem:[%s327_s15 + $0x10] sm:$0xff]  ;;  %v1660_v10 = vld [vmem:[%s327_s15 + $0x18] sm:$0xff]  ;;  %371 = vrot.lane.b32.xlu1 %v353_v4, %s2102_s16  ;;  %v354_v11 = vmax.f32 %v337_v6, %v1662_v7  ;;  %v1663_v16 = vld [vmem:[%s327_s15 + $0x48] sm:$0xff]  ;;  %991 = vst.msk [vmem:[#allocation3 + $0x90] sm:$0xff] %vm773_vm3, %v2101_v0  ;;  %s2112_s27 = smov 48   ;;  %s2113_s13 = smov 56  }
  0x14   : > { %367 = vrot.lane.b32.xlu0 %v351_v8, %s2102_s16  ;;  %v352_v12 = vmax.f32 %v335_v9, %v1660_v10  ;;  %v339_v13 = vld [vmem:[%s327_s15 + $0x50] sm:$0xff]  ;;  %v1664_v14 = vld [vmem:[%s327_s15 + $0x58] sm:$0xff]  ;;  %v355_v18 = vmax.f32 %v338_v15, %v1663_v16  ;;  %v340_v21 = vld [vmem:[%s327_s15 + $0x60] sm:$0xff]  ;;  %989 = vst.msk [vmem:[#allocation3 + $0x8] sm:$0x3] %vm988_vm12, %v2101_v0  ;;  %vm1480_vm14 = vcmask 1043456  }
  0x15   : > { %v356_v17 = vmax.f32 %v339_v13, %v1664_v14  ;;  %v341_v19 = vld [vmem:[%s327_s15 + $0x70] sm:$0xff]  ;;  %v1666_v20 = vld [vmem:[%s327_s15 + $0x78] sm:$0xff]  ;;  %v1665_v22 = vld [vmem:[%s327_s15 + $0x68] sm:$0xff]  ;;  %992 = vst.msk [vmem:[#allocation3 + $0x98] sm:$0x3] %vm988_vm12, %v2101_v0  ;;  %vm1384_vm15 = vcmask 326656  }
  0x16   : > { %v358_v23 = vmax.f32 %v341_v19, %v1666_v20  ;;  %v357_v24 = vmax.f32 %v340_v21, %v1665_v22  ;;  %v2086_v2 = vld [vmem:[%s2687_s1 + $0x8] sm:$0xff]   ;;  %v2087_v6 = vld [vmem:[%s2687_s1 + $0x10] ss:$0 sps:$4 sm:$0x33]   ;;  %997 = vst.msk [vmem:[#allocation3 + $0x30] sm:$0x1] %vm993_vm13, %v2101_v0 }
  0x17   : > { %373 = vrot.lane.b32.xlu1 %v354_v11, %s2102_s16  ;;  %v452_v41 = vld [vmem:[#allocation2 + $0x2] sm:$0xff]  ;;  %1711 = vmatprep.subr.bf16.mxu0 %v2086_v2  ;;  %v882_v7 = vsel %vm880_vm4, %v2087_v6, 0  ;;  %998 = vst.msk [vmem:[#allocation3 + $0x40] sm:$0x1] %vm993_vm13, %v2101_v0  ;;  %994 = vst.msk [vmem:[#allocation3] sm:$0x1] %vm993_vm13, %v2101_v0 }
  0x18   : > { %369 = vrot.lane.b32.xlu0 %v352_v12, %s2102_s16  ;;  %1712 = vmatpush3.bf16.msra.mxu0 %v2086_v2  ;;  %995 = vst.msk [vmem:[#allocation3 + $0x10] sm:$0x1] %vm993_vm13, %v2101_v0  ;;  %996 = vst.msk [vmem:[#allocation3 + $0x20] sm:$0x1] %vm993_vm13, %v2101_v0  ;;  %vm1402_vm1 = vcmask 457728   ;;  %vm1411_vm2 = vcmask 523264  }
  0x19   : > { %1741 = vmatprep.subr.msk.bf16.mxu0 %vm880_vm4, %v2087_v6  ;;  %999 = vst.msk [vmem:[#allocation3 + $0x50] sm:$0x1] %vm993_vm13, %v2101_v0  ;;  %1000 = vst.msk [vmem:[#allocation3 + $0x60] sm:$0x1] %vm993_vm13, %v2101_v0  ;;  %vm1467_vm4 = vcmask 588800  }
  0x1a   : > { %1001 = vst.msk [vmem:[#allocation3 + $0x70] sm:$0x1] %vm993_vm13, %v2101_v0  ;;  %1002 = vst.msk [vmem:[#allocation3 + $0x80] sm:$0x1] %vm993_vm13, %v2101_v0 }
  0x1b   : > { %377 = vrot.lane.b32.xlu1 %v356_v17, %s2102_s16  ;;  %1003 = vst.msk [vmem:[#allocation3 + $0x90] sm:$0x1] %vm993_vm13, %v2101_v0  ;;  %1005 = vst.msk [vmem:[#allocation3 + $0x19] sm:$0x1] %vm993_vm13, %v2101_v0 }
  0x1c   : > { %375 = vrot.lane.b32.xlu0 %v355_v18, %s2102_s16  ;;  %1714 = vmatpush3.bf16.msra.mxu0 %v882_v7  ;;  %1006 = vst.msk [vmem:[#allocation3 + $0x29] sm:$0x1] %vm993_vm13, %v2101_v0  ;;  %1007 = vst.msk [vmem:[#allocation3 + $0x39] sm:$0x1] %vm993_vm13, %v2101_v0 }
  0x1d   : > { %1008 = vst.msk [vmem:[#allocation3 + $0x49] sm:$0x1] %vm993_vm13, %v2101_v0  ;;  %1009 = vst.msk [vmem:[#allocation3 + $0x59] sm:$0x1] %vm993_vm13, %v2101_v0 }
  0x1e   : > { %1010 = vst.msk [vmem:[#allocation3 + $0x69] sm:$0x1] %vm993_vm13, %v2101_v0  ;;  %1011 = vst.msk [vmem:[#allocation3 + $0x79] sm:$0x1] %vm993_vm13, %v2101_v0 }
  0x1f   : > { %381 = vrot.lane.b32.xlu1 %v358_v23, %s2102_s16  ;;  %1012 = vst.msk [vmem:[#allocation3 + $0x89] sm:$0x1] %vm993_vm13, %v2101_v0  ;;  %1004 = vst.msk [vmem:[#allocation3 + $0x9] sm:$0x1] %vm993_vm13, %v2101_v0 }
  0x20   : > { %379 = vrot.lane.b32.xlu0 %v357_v24, %s2102_s16  ;;  %1013 = vst.msk [vmem:[#allocation3 + $0x99] sm:$0x1] %vm993_vm13, %v2101_v0  ;;  %s2114_s16 = smov 64  }
  0x85   : > { %v372_v25 = vpop.permute.xlu1 %371 }
  0x86   : > { %v393_v26 = vmax.f32 %v353_v4, %v372_v25  ;;  %v368_v27 = vpop.permute.xlu0 %367 }
  0x87   : > { %v391_v28 = vmax.f32 %v351_v8, %v368_v27 }
  0x88   : > { %430 = vst.msk [vmem:[#allocation2 + $0x31] sm:$0xff] %vm399_vm0, %v393_v26 }
  0x89   : > { %428 = vst.msk [vmem:[#allocation2 + $0x11] sm:$0xff] %vm399_vm0, %v391_v28  ;;  %v374_v29 = vpop.permute.xlu1 %373 }
  0x8a   : > { %v394_v30 = vmax.f32 %v354_v11, %v374_v29  ;;  %v370_v31 = vpop.permute.xlu0 %369 }
  0x8b   : > { %v392_v32 = vmax.f32 %v352_v12, %v370_v31  ;;  %v492_v31 = vld [vmem:[#allocation2 + $0x90] sm:$0xff] }
  0x8c   : > { %431 = vst.msk [vmem:[#allocation2 + $0x41] sm:$0xff] %vm399_vm0, %v394_v30 }
  0x8d   : > { %429 = vst.msk [vmem:[#allocation2 + $0x21] sm:$0xff] %vm399_vm0, %v392_v32  ;;  %v378_v33 = vpop.permute.xlu1 %377 }
  0x8e   : > { %v376_v34 = vpop.permute.xlu0 %375  ;;  %v396_v36 = vmax.f32 %v356_v17, %v378_v33  ;;  %v500_v33 = vld [vmem:[#allocation2 + $0x91] sm:$0xff] }
  0x8f   : > { %v395_v37 = vmax.f32 %v355_v18, %v376_v34  ;;  %v447_v43 = vld [vmem:[#allocation2 + $0x31] sm:$0xff] }
  0x90   : > { %v445_v38 = vld [vmem:[#allocation2 + $0x11] sm:$0xff]  ;;  %433 = vst.msk [vmem:[#allocation2 + $0x61] sm:$0xff] %vm399_vm0, %v396_v36 }
  0x91   : > { %432 = vst.msk [vmem:[#allocation2 + $0x51] sm:$0xff] %vm399_vm0, %v395_v37  ;;  %v1765_v39 = vpack.i.bf16 %v445_v38, %v444_v35  ;;  %v382_v40 = vpop.permute.xlu1 %381  ;;  %v453_v42 = vld [vmem:[#allocation2 + $0x12] sm:$0xff] }
  0x92   : > { %v398_v44 = vmax.f32 %v358_v23, %v382_v40  ;;  %v380_v45 = vpop.permute.xlu0 %379  ;;  %v1775_v48 = vpack.i.bf16 %v453_v42, %v452_v41  ;;  %v455_v52 = vld [vmem:[#allocation2 + $0x32] sm:$0xff] }
  0x93   : > { %1766 = vrot.lane.b32.xlu0 %v1765_v39, %s2103_s17  ;;  %v397_v46 = vmax.f32 %v357_v24, %v380_v45  ;;  %v2252_v53 = vld [vmem:[#allocation2 + $0x10] sm:$0xff]  ;;  %v2258_v57 = vld [vmem:[#allocation2 + $0x40] sm:$0xff] }
  0x94   : > { %v446_v47 = vld [vmem:[#allocation2 + $0x21] sm:$0xff]  ;;  %435 = vst.msk [vmem:[#allocation2 + $0x81] sm:$0xff] %vm399_vm0, %v398_v44  ;;  %v2256_v56 = vld [vmem:[#allocation2 + $0x30] sm:$0xff] }
  0x95   : > { %v1770_v49 = vpack.i.bf16 %v447_v43, %v446_v47  ;;  %434 = vst.msk [vmem:[#allocation2 + $0x71] sm:$0xff] %vm399_vm0, %v397_v46  ;;  %v2248_v50 = vld [vmem:[#allocation2 + $0x20] sm:$0xff]  ;;  %v1795_v58 = vpack.i.bf16 %v446_v47, %v445_v38  ;;  %v1790_v59 = vpack.i.bf16 %v2258_v57, %v2256_v56  ;;  %v508_v35 = vld [vmem:[#allocation2 + $0x92] sm:$0xff] }
  0x96   : > { %v454_v51 = vld [vmem:[#allocation2 + $0x22] sm:$0xff]  ;;  %v1785_v54 = vpack.i.bf16 %v2248_v50, %v2252_v53  ;;  %v1815_v3 = vpack.i.bf16 %v2256_v56, %v2248_v50 }
  0x97   : > { %1776 = vrot.lane.b32.xlu0 %v1775_v48, %s2104_s18  ;;  %1771 = vrot.lane.b32.xlu1 %v1770_v49, %s2103_s17  ;;  %v1780_v55 = vpack.i.bf16 %v455_v52, %v454_v51  ;;  %v471_v60 = vld [vmem:[#allocation2 + $0x41] sm:$0xff]  ;;  %v1805_v62 = vpack.i.bf16 %v454_v51, %v453_v42 }
  0x98   : > { %v1800_v63 = vpack.i.bf16 %v471_v60, %v447_v43  ;;  %v479_v1 = vld [vmem:[#allocation2 + $0x42] sm:$0xff]  ;;  %v2276_v5 = vld [vmem:[#allocation2 + $0x50] sm:$0xff] }
  0x99   : > { %v1810_v4 = vpack.i.bf16 %v479_v1, %v455_v52  ;;  %v1820_v8 = vpack.i.bf16 %v2276_v5, %v2258_v57  ;;  %v496_v9 = vld [vmem:[#allocation2 + $0x51] sm:$0xff]  ;;  %v450_v14 = vld [vmem:[#allocation2 + $0x61] sm:$0xff] }
  0x9a   : > { %v1830_v10 = vpack.i.bf16 %v496_v9, %v471_v60  ;;  %v504_v11 = vld [vmem:[#allocation2 + $0x52] sm:$0xff]  ;;  %v2291_v16 = vld [vmem:[#allocation2 + $0x60] sm:$0xff]  ;;  %v1875_v23 = vpack.i.bf16 %v450_v14, %v496_v9 }
  0x9b   : > { %1786 = vrot.lane.b32.xlu0 %v1785_v54, %s2105_s19  ;;  %1781 = vrot.lane.b32.xlu1 %v1780_v55, %s2104_s18  ;;  %v1845_v13 = vpack.i.bf16 %v504_v11, %v479_v1  ;;  %v458_v18 = vld [vmem:[#allocation2 + $0x62] sm:$0xff]  ;;  %v1865_v19 = vpack.i.bf16 %v2291_v16, %v2276_v5 }
  0x9c   : > { %v451_v12 = vld [vmem:[#allocation2 + $0x71] sm:$0xff]  ;;  %v467_v22 = vld [vmem:[#allocation2 + $0x80] sm:$0xff]  ;;  %v1885_v26 = vpack.i.bf16 %v458_v18, %v504_v11 }
  0x9d   : > { %v1850_v15 = vpack.i.bf16 %v451_v12, %v450_v14  ;;  %v459_v17 = vld [vmem:[#allocation2 + $0x72] sm:$0xff]  ;;  %v475_v25 = vld [vmem:[#allocation2 + $0x81] sm:$0xff]  ;;  %v1900_v32 = vpack.i.bf16 %v492_v31, %v467_v22 }
  0x9e   : > { %v1860_v20 = vpack.i.bf16 %v459_v17, %v458_v18  ;;  %v2297_v21 = vld [vmem:[#allocation2 + $0x70] sm:$0xff]  ;;  %v1880_v27 = vpack.i.bf16 %v475_v25, %v451_v12  ;;  %v483_v28 = vld [vmem:[#allocation2 + $0x82] sm:$0xff]  ;;  %v1910_v34 = vpack.i.bf16 %v500_v33, %v475_v25 }
  0x9f   : > { %1796 = vrot.lane.b32.xlu0 %v1795_v58, %s2106_s22  ;;  %1791 = vrot.lane.b32.xlu1 %v1790_v59, %s2105_s19  ;;  %v1870_v24 = vpack.i.bf16 %v467_v22, %v2297_v21  ;;  %v1895_v29 = vpack.i.bf16 %v2297_v21, %v2291_v16  ;;  %v1890_v30 = vpack.i.bf16 %v483_v28, %v459_v17  ;;  %v436_v48 = vld [vmem:[#allocation2] sm:$0xff] }
  0xa0   : > { %v1920_v36 = vpack.i.bf16 %v508_v35, %v483_v28 }
  0xa3   : > { %1806 = vrot.lane.b32.xlu0 %v1805_v62, %s2107_s25  ;;  %1801 = vrot.lane.b32.xlu1 %v1800_v63, %s2106_s22 }
  0xa7   : > { %1816 = vrot.lane.b32.xlu0 %v1815_v3, %s2108_s28  ;;  %1811 = vrot.lane.b32.xlu1 %v1810_v4, %s2107_s25 }
  0xab   : > { %1826 = vrot.lane.b32.xlu0 %v1770_v49, %s2109_s29  ;;  %1821 = vrot.lane.b32.xlu1 %v1820_v8, %s2108_s28 }
  0xaf   : > { %1836 = vrot.lane.b32.xlu0 %v1780_v55, %s2110_s11  ;;  %1831 = vrot.lane.b32.xlu1 %v1830_v10, %s2109_s29 }
  0xb3   : > { %1846 = vrot.lane.b32.xlu0 %v1845_v13, %s2110_s11  ;;  %1841 = vrot.lane.b32.xlu1 %v1830_v10, %s2103_s17 }
  0xb7   : > { %1856 = vrot.lane.b32.xlu0 %v1845_v13, %s2104_s18  ;;  %1851 = vrot.lane.b32.xlu1 %v1850_v15, %s2103_s17  ;;  %s1692_s17 = sshll.u32 %s2698_s10, 6 }
  0xb8   : > { %s2665_s24 = scalar_lea.vmem %s2695_s9, %s1692_s17 }
  0xbb   : > { %1866 = vrot.lane.b32.xlu0 %v1865_v19, %s2105_s19  ;;  %1861 = vrot.lane.b32.xlu1 %v1860_v20, %s2104_s18 }
  0xbf   : > { %1876 = vrot.lane.b32.xlu0 %v1875_v23, %s2106_s22  ;;  %1871 = vrot.lane.b32.xlu1 %v1870_v24, %s2105_s19  ;;  %s2111_s19 = smov 40  }
  0xc3   : > { %1886 = vrot.lane.b32.xlu0 %v1885_v26, %s2107_s25  ;;  %1881 = vrot.lane.b32.xlu1 %v1880_v27, %s2106_s22 }
  0xc7   : > { %1896 = vrot.lane.b32.xlu0 %v1895_v29, %s2108_s28  ;;  %1891 = vrot.lane.b32.xlu1 %v1890_v30, %s2107_s25 }
  0xcb   : > { %1906 = vrot.lane.b32.xlu0 %v1850_v15, %s2109_s29  ;;  %1901 = vrot.lane.b32.xlu1 %v1900_v32, %s2108_s28 }
  0xcf   : > { %1916 = vrot.lane.b32.xlu0 %v1860_v20, %s2110_s11  ;;  %1911 = vrot.lane.b32.xlu1 %v1910_v34, %s2109_s29 }
  0xd3   : > { %1921 = vrot.lane.b32.xlu1 %v1920_v36, %s2110_s11 }
 0x105   : > { %v1767_v37 = vpop.permute.xlu0 %1766 }
 0x106   : > { %v1769_v44 = vunpack.i.h.bf16 %v1767_v37  ;;  %v1768_v45 = vunpack.i.l.bf16 %v1767_v37 }
 0x108   : > { %v766_v55 = vsel %vm399_vm0, %v2252_v53, %v1769_v44  ;;  %v765_v58 = vsel %vm399_vm0, %v436_v48, %v1768_v45 }
 0x109   : > { %v1772_v38 = vpop.permute.xlu1 %1771  ;;  %v1777_v39 = vpop.permute.xlu0 %1776 }
 0x10a   : > { %v1774_v49 = vunpack.i.h.bf16 %v1772_v38  ;;  %v1773_v51 = vunpack.i.l.bf16 %v1772_v38  ;;  %v1779_v52 = vunpack.i.h.bf16 %v1777_v39  ;;  %v1778_v54 = vunpack.i.l.bf16 %v1777_v39 }
 0x10c   : > { %v768_v4 = vsel %vm399_vm0, %v2256_v56, %v1774_v49  ;;  %v767_v6 = vsel %vm399_vm0, %v2248_v50, %v1773_v51  ;;  %v774_v53 = vsel %vm773_vm3, %v765_v58, %v1778_v54  ;;  %v775_v9 = vsel %vm773_vm3, %v766_v55, %v1779_v52 }
 0x10d   : > { %v1782_v40 = vpop.permute.xlu1 %1781  ;;  %v1787_v41 = vpop.permute.xlu0 %1786 }
 0x10e   : > { %v1784_v59 = vunpack.i.h.bf16 %v1782_v40  ;;  %v1783_v60 = vunpack.i.l.bf16 %v1782_v40  ;;  %v1789_v63 = vunpack.i.h.bf16 %v1787_v41  ;;  %v1788_v1 = vunpack.i.l.bf16 %v1787_v41 }
 0x110   : > { %v776_v12 = vsel %vm773_vm3, %v767_v6, %v1783_v60  ;;  %v777_v13 = vsel %vm773_vm3, %v768_v4, %v1784_v59  ;;  %v783_v18 = vsel %vm782_vm5, %v774_v53, %v1788_v1  ;;  %v784_v50 = vsel %vm782_vm5, %v775_v9, %v1789_v63 }
 0x111   : > { %v1792_v42 = vpop.permute.xlu1 %1791  ;;  %v1797_v43 = vpop.permute.xlu0 %1796 }
 0x112   : > { %v1794_v2 = vunpack.i.h.bf16 %v1792_v42  ;;  %v1793_v3 = vunpack.i.l.bf16 %v1792_v42  ;;  %v1799_v7 = vunpack.i.h.bf16 %v1797_v43  ;;  %v1798_v8 = vunpack.i.l.bf16 %v1797_v43 }
 0x114   : > { %v785_v19 = vsel %vm782_vm5, %v776_v12, %v1793_v3  ;;  %v786_v20 = vsel %vm782_vm5, %v777_v13, %v1794_v2  ;;  %v792_v22 = vsel %vm791_vm6, %v783_v18, %v1798_v8  ;;  %v793_v23 = vsel %vm791_vm6, %v784_v50, %v1799_v7 }
 0x115   : > { %v2315_v46 = vpop.permute.xlu1 %1801  ;;  %v1807_v47 = vpop.permute.xlu0 %1806 }
 0x116   : > { %v1809_v10 = vunpack.i.h.bf16 %v1807_v47  ;;  %v1808_v11 = vunpack.i.l.bf16 %v1807_v47  ;;  %v1804_v26 = vunpack.i.h.bf16 %v2315_v46  ;;  %v1803_v27 = vunpack.i.l.bf16 %v2315_v46 }
 0x118   : > { %v801_v28 = vsel %vm800_vm7, %v792_v22, %v1808_v11  ;;  %v802_v29 = vsel %vm800_vm7, %v793_v23, %v1809_v10  ;;  %v794_v44 = vsel %vm791_vm6, %v785_v19, %v1803_v27  ;;  %v795_v45 = vsel %vm791_vm6, %v786_v20, %v1804_v26 }
 0x119   : > { %v1812_v61 = vpop.permute.xlu1 %1811  ;;  %v1817_v62 = vpop.permute.xlu0 %1816 }
 0x11a   : > { %v1819_v14 = vunpack.i.h.bf16 %v1817_v62  ;;  %v1818_v15 = vunpack.i.l.bf16 %v1817_v62  ;;  %v1814_v30 = vunpack.i.h.bf16 %v1812_v61  ;;  %v1813_v31 = vunpack.i.l.bf16 %v1812_v61 }
 0x11c   : > { %v810_v32 = vsel %vm809_vm8, %v801_v28, %v1818_v15  ;;  %v811_v33 = vsel %vm809_vm8, %v802_v29, %v1819_v14  ;;  %v803_v48 = vsel %vm800_vm7, %v794_v44, %v1813_v31  ;;  %v804_v49 = vsel %vm800_vm7, %v795_v45, %v1814_v30 }
 0x11d   : > { %v1822_v17 = vpop.permute.xlu1 %1821  ;;  %v1827_v56 = vpop.permute.xlu0 %1826 }
 0x11e   : > { %v1829_v24 = vunpack.i.h.bf16 %v1827_v56  ;;  %v1828_v25 = vunpack.i.l.bf16 %v1827_v56  ;;  %v1824_v36 = vunpack.i.h.bf16 %v1822_v17  ;;  %v1823_v37 = vunpack.i.l.bf16 %v1822_v17 }
 0x120   : > { %v819_v42 = vsel %vm818_vm9, %v810_v32, %v1828_v25  ;;  %v820_v43 = vsel %vm818_vm9, %v811_v33, %v1829_v24  ;;  %v813_v55 = vsel %vm809_vm8, %v804_v49, %v1824_v36  ;;  %v812_v58 = vsel %vm809_vm8, %v803_v48, %v1823_v37 }
 0x121   : > { %v1832_v34 = vpop.permute.xlu1 %1831  ;;  %v1837_v35 = vpop.permute.xlu0 %1836 }
 0x122   : > { %v1839_v38 = vunpack.i.h.bf16 %v1837_v35  ;;  %v1838_v39 = vunpack.i.l.bf16 %v1837_v35  ;;  %v1834_v40 = vunpack.i.h.bf16 %v1832_v34  ;;  %v1833_v41 = vunpack.i.l.bf16 %v1832_v34 }
 0x124   : > { %v828_v46 = vsel %vm827_vm10, %v819_v42, %v1838_v39  ;;  %v829_v47 = vsel %vm827_vm10, %v820_v43, %v1839_v38  ;;  %v821_v61 = vsel %vm818_vm9, %v812_v58, %v1833_v41  ;;  %v822_v62 = vsel %vm818_vm9, %v813_v55, %v1834_v40 }
 0x125   : > { %v1842_v51 = vpop.permute.xlu1 %1841  ;;  %v1847_v52 = vpop.permute.xlu0 %1846  ;;  %v836_v54 = vpack.c.bf16 %v829_v47, %v828_v46 }
 0x126   : > { %v1849_v59 = vunpack.i.h.bf16 %v1847_v52  ;;  %v1848_v60 = vunpack.i.l.bf16 %v1847_v52  ;;  %v1844_v9 = vunpack.i.h.bf16 %v1842_v51  ;;  %v1843_v10 = vunpack.i.l.bf16 %v1842_v51 }
 0x127   : > { %1715 = vmatprep.mubr.msk.bf16.mxu0 %vm867_vm11, %v836_v54 }
 0x128   : > { %v831_v63 = vsel %vm827_vm10, %v822_v62, %v1849_v59  ;;  %v830_v1 = vsel %vm827_vm10, %v821_v61, %v1848_v60  ;;  %v769_v56 = vsel %vm399_vm0, %v2258_v57, %v1843_v10  ;;  %v770_v18 = vsel %vm399_vm0, %v2276_v5, %v1844_v9 }
 0x129   : > { %v837_v2 = vpack.c.bf16 %v831_v63, %v830_v1  ;;  %v1852_v3 = vpop.permute.xlu1 %1851  ;;  %v1857_v4 = vpop.permute.xlu0 %1856 }
 0x12a   : > { %v1854_v13 = vunpack.i.h.bf16 %v1852_v3  ;;  %v1853_v14 = vunpack.i.l.bf16 %v1852_v3  ;;  %v1859_v15 = vunpack.i.h.bf16 %v1857_v4  ;;  %v1858_v17 = vunpack.i.l.bf16 %v1857_v4 }
 0x12b   : > { %1716 = vmatmul.mubr.msk.bf16.vlgmr.msra.gmra.mrb[0].mxu0 %vm867_vm11, %v837_v2 }
 0x12c   : > { %v771_v27 = vsel %vm399_vm0, %v2291_v16, %v1853_v14  ;;  %v772_v28 = vsel %vm399_vm0, %v2297_v21, %v1854_v13  ;;  %v779_v57 = vsel %vm773_vm3, %v770_v18, %v1859_v15  ;;  %v778_v5 = vsel %vm773_vm3, %v769_v56, %v1858_v17 }
 0x12d   : > { %v1862_v6 = vpop.permute.xlu1 %1861  ;;  %v1867_v7 = vpop.permute.xlu0 %1866  ;;  %vm1393_vm0 = vcmask 392192  }
 0x12e   : > { %v1864_v50 = vunpack.i.h.bf16 %v1862_v6  ;;  %v1863_v19 = vunpack.i.l.bf16 %v1862_v6  ;;  %v1869_v23 = vunpack.i.h.bf16 %v1867_v7  ;;  %v1868_v24 = vunpack.i.l.bf16 %v1867_v7 }
 0x130   : > { %v780_v33 = vsel %vm773_vm3, %v771_v27, %v1863_v19  ;;  %v781_v34 = vsel %vm773_vm3, %v772_v28, %v1864_v50  ;;  %v787_v16 = vsel %vm782_vm5, %v778_v5, %v1868_v24  ;;  %v788_v21 = vsel %vm782_vm5, %v779_v57, %v1869_v23 }
 0x131   : > { %v1872_v8 = vpop.permute.xlu1 %1871  ;;  %v1877_v53 = vpop.permute.xlu0 %1876 }
 0x132   : > { %v1874_v25 = vunpack.i.h.bf16 %v1872_v8  ;;  %v1873_v26 = vunpack.i.l.bf16 %v1872_v8  ;;  %v1879_v29 = vunpack.i.h.bf16 %v1877_v53  ;;  %v1878_v30 = vunpack.i.l.bf16 %v1877_v53 }
 0x134   : > { %v789_v39 = vsel %vm782_vm5, %v780_v33, %v1873_v26  ;;  %v790_v40 = vsel %vm782_vm5, %v781_v34, %v1874_v25  ;;  %v796_v41 = vsel %vm791_vm6, %v787_v16, %v1878_v30  ;;  %v797_v42 = vsel %vm791_vm6, %v788_v21, %v1879_v29  ;;  %v2445_v25 = vld [vmem:[%s2689_s3] ss:$0 sm:$0xff] }
 0x135   : > { %v1882_v11 = vpop.permute.xlu1 %1881  ;;  %v1887_v12 = vpop.permute.xlu0 %1886  ;;  %v2452_v30 = vld [vmem:[%s2690_s4] ss:$0 sm:$0xff] }
 0x136   : > { %v1889_v31 = vunpack.i.h.bf16 %v1887_v12  ;;  %v1888_v32 = vunpack.i.l.bf16 %v1887_v12  ;;  %v1884_v45 = vunpack.i.h.bf16 %v1882_v11  ;;  %v1883_v46 = vunpack.i.l.bf16 %v1882_v11 }
 0x138   : > { %v805_v47 = vsel %vm800_vm7, %v796_v41, %v1888_v32  ;;  %v806_v48 = vsel %vm800_vm7, %v797_v42, %v1889_v31  ;;  %v798_v4 = vsel %vm791_vm6, %v789_v39, %v1883_v46  ;;  %v799_v6 = vsel %vm791_vm6, %v790_v40, %v1884_v45  ;;  %v1031_v39 = vld [vmem:[#allocation3 + $0x1] sm:$0xff] }
 0x139   : > { %v1892_v20 = vpop.permute.xlu1 %1891  ;;  %v1897_v22 = vpop.permute.xlu0 %1896  ;;  %v1039_v45 = vld [vmem:[#allocation3 + $0x2] sm:$0xff] }
 0x13a   : > { %v1899_v35 = vunpack.i.h.bf16 %v1897_v22  ;;  %v1898_v36 = vunpack.i.l.bf16 %v1897_v22  ;;  %v1894_v49 = vunpack.i.h.bf16 %v1892_v20  ;;  %v1893_v51 = vunpack.i.l.bf16 %v1892_v20  ;;  %v2439_v20 = vld [vmem:[%s2688_s2] ss:$0 sm:$0xff] }
 0x13c   : > { %v814_v52 = vsel %vm809_vm8, %v805_v47, %v1898_v36  ;;  %v815_v54 = vsel %vm809_vm8, %v806_v48, %v1899_v35  ;;  %v807_v53 = vsel %vm800_vm7, %v798_v4, %v1893_v51  ;;  %v808_v9 = vsel %vm800_vm7, %v799_v6, %v1894_v49 }
 0x13d   : > { %v1902_v37 = vpop.permute.xlu1 %1901  ;;  %v1907_v38 = vpop.permute.xlu0 %1906 }
 0x13e   : > { %v1909_v43 = vunpack.i.h.bf16 %v1907_v38  ;;  %v1908_v44 = vunpack.i.l.bf16 %v1907_v38  ;;  %v1904_v59 = vunpack.i.h.bf16 %v1902_v37  ;;  %v1903_v60 = vunpack.i.l.bf16 %v1902_v37 }
 0x140   : > { %v823_v63 = vsel %vm818_vm9, %v814_v52, %v1908_v44  ;;  %v824_v1 = vsel %vm818_vm9, %v815_v54, %v1909_v43  ;;  %v816_v12 = vsel %vm809_vm8, %v807_v53, %v1903_v60  ;;  %v817_v13 = vsel %vm809_vm8, %v808_v9, %v1904_v59 }
 0x141   : > { %v1912_v55 = vpop.permute.xlu1 %1911  ;;  %v1917_v58 = vpop.permute.xlu0 %1916 }
 0x142   : > { %v1919_v61 = vunpack.i.h.bf16 %v1917_v58  ;;  %v1918_v62 = vunpack.i.l.bf16 %v1917_v58  ;;  %v1914_v2 = vunpack.i.h.bf16 %v1912_v55  ;;  %v1913_v3 = vunpack.i.l.bf16 %v1912_v55 }
 0x144   : > { %v832_v7 = vsel %vm827_vm10, %v823_v63, %v1918_v62  ;;  %v833_v8 = vsel %vm827_vm10, %v824_v1, %v1919_v61  ;;  %v825_v17 = vsel %vm818_vm9, %v816_v12, %v1913_v3  ;;  %v826_v56 = vsel %vm818_vm9, %v817_v13, %v1914_v2  ;;  %v2088_v62 = vld [vmem:[%s2691_s5] sm:$0xff]   ;;  %v2089_v3 = vld [vmem:[%s2691_s5 + $0x8] sm:$0xff]  }
 0x145   : > { %v838_v10 = vpack.c.bf16 %v833_v8, %v832_v7  ;;  %v1922_v11 = vpop.permute.xlu1 %1921  ;;  %1723 = vmatprep.subr.bf16.mxu1 %v2088_v62 }
 0x146   : > { %v1924_v14 = vunpack.i.h.bf16 %v1922_v11  ;;  %v1923_v15 = vunpack.i.l.bf16 %v1922_v11  ;;  %1724 = vmatpush3.bf16.msra.mxu1 %v2088_v62  ;;  %v1095_v62 = vld [vmem:[#allocation3 + $0x92] sm:$0xff] }
 0x147   : > { %1719 = vmatprep.mubr.msk.bf16.mxu0 %vm867_vm11, %v838_v10  ;;  %1725 = vmatprep.subr.bf16.mxu1 %v2089_v3 }
 0x148   : > { %v834_v18 = vsel %vm827_vm10, %v825_v17, %v1923_v15  ;;  %v835_v50 = vsel %vm827_vm10, %v826_v56, %v1924_v14  ;;  %v2090_v14 = vld [vmem:[%s2691_s5 + $0x10] sm:$0xff]  }
 0x149   : > { %v839_v19 = vpack.c.bf16 %v835_v50, %v834_v18 }
 0x14a   : > { %1726 = vmatpush3.bf16.msra.mxu1 %v2089_v3 }
 0x14b   : > { %1720 = vmatmul.mubr.msk.bf16.gmra.mrb[4].mxu0 %vm867_vm11, %v839_v19  ;;  %1727 = vmatprep.subr.bf16.mxu1 %v2090_v14 }
 0x14e   : > { %1728 = vmatpush3.bf16.msra.mxu1 %v2090_v14 }
 0x1fe   : > { %v1717_v22 = vpop.f32.mrb[0].mxu0 }
 0x1ff   : > { %v927_v23 = vadd.f32 %v1717_v22, %v2439_v20  ;;  %v918_v24 = vpop.f32.mrb[1].mxu0 }
 0x200   : > { %v919_v26 = vadd.f32 %v2439_v20, %v918_v24  ;;  %v1718_v27 = vpop.f32.mrb[2].mxu0 }
 0x201   : > { %v951_v28 = vmax.f32 %v927_v23, 0.0  ;;  %v930_v0 = vadd.f32 %v1718_v27, %v2439_v20  ;;  %v921_v29 = vpop.f32.mrb[3].mxu0 }
 0x202   : > { %v949_v57 = vmax.f32 %v919_v26, 0.0  ;;  %v922_v5 = vadd.f32 %v2439_v20, %v921_v29 }
 0x203   : > { %v966_v31 = vmul.f32 %v2445_v25, %v951_v28  ;;  %v952_v32 = vmax.f32 %v930_v0, 0.0  ;;  %v2091_v28 = vld [vmem:[%s2691_s5 + $0x18] sm:$0xff]  }
 0x204   : > { %v964_v33 = vmul.f32 %v2445_v25, %v949_v57  ;;  %v950_v34 = vmax.f32 %v922_v5, 0.0  ;;  %1729 = vmatprep.subr.bf16.mxu1 %v2091_v28 }
 0x205   : > { %v981_v35 = vadd.f32 %v2452_v30, %v966_v31  ;;  %v967_v36 = vmul.f32 %v2445_v25, %v952_v32  ;;  %1730 = vmatpush3.bf16.msra.mxu1 %v2091_v28 }
 0x206   : > { %v979_v37 = vadd.f32 %v2452_v30, %v964_v33  ;;  %v965_v38 = vmul.f32 %v2445_v25, %v950_v34 }
 0x207   : > { %1017 = vst.msk [vmem:[#allocation3 + $0x31] sm:$0xff] %vm773_vm3, %v981_v35  ;;  %v982_v16 = vadd.f32 %v2452_v30, %v967_v36 }
 0x208   : > { %1015 = vst.msk [vmem:[#allocation3 + $0x11] sm:$0xff] %vm773_vm3, %v979_v37  ;;  %v980_v21 = vadd.f32 %v2452_v30, %v965_v38 }
 0x209   : > { %1018 = vst.msk [vmem:[#allocation3 + $0x41] sm:$0xff] %vm773_vm3, %v982_v16 }
 0x20a   : > { %1016 = vst.msk [vmem:[#allocation3 + $0x21] sm:$0xff] %vm773_vm3, %v980_v21 }
 0x20e   : > { %v2467_v42 = vld [vmem:[#allocation3 + $0x30] sm:$0xff] }
 0x20f   : > { %v1032_v40 = vld [vmem:[#allocation3 + $0x11] sm:$0xff] }
 0x210   : > { %v1925_v41 = vpack.i.bf16 %v1032_v40, %v1031_v39  ;;  %v2469_v43 = vld [vmem:[#allocation3 + $0x40] sm:$0xff]  ;;  %v1040_v46 = vld [vmem:[#allocation3 + $0x12] sm:$0xff] }
 0x211   : > { %v1935_v44 = vpack.i.bf16 %v2469_v43, %v2467_v42  ;;  %v2474_v47 = vld [vmem:[#allocation3 + $0x41] sm:$0xff]  ;;  %v1930_v48 = vpack.i.bf16 %v1040_v46, %v1039_v45  ;;  %v1057_v49 = vld [vmem:[#allocation3 + $0x31] sm:$0xff] }
 0x212   : > { %1926 = vrot.lane.b32.xlu0 %v1925_v41, %s2104_s18  ;;  %v1940_v51 = vpack.i.bf16 %v2474_v47, %v1057_v49  ;;  %v2478_v52 = vld [vmem:[#allocation3 + $0x20] sm:$0xff]  ;;  %v2484_v55 = vld [vmem:[#allocation3 + $0x10] sm:$0xff] }
 0x213   : > { %1936 = vrot.lane.b32.xlu1 %v1935_v44, %s2108_s28  ;;  %v2481_v54 = vld [vmem:[#allocation3 + $0x42] sm:$0xff]  ;;  %v1960_v58 = vpack.i.bf16 %v2478_v52, %v2484_v55  ;;  %v1065_v59 = vld [vmem:[#allocation3 + $0x32] sm:$0xff]  ;;  %v1975_v22 = vpack.i.bf16 %v2467_v42, %v2478_v52 }
 0x214   : > { %v1945_v60 = vpack.i.bf16 %v2481_v54, %v1065_v59  ;;  %v1056_v61 = vld [vmem:[#allocation3 + $0x21] sm:$0xff] }
 0x215   : > { %v1965_v63 = vpack.i.bf16 %v1056_v61, %v1032_v40  ;;  %v1950_v1 = vpack.i.bf16 %v1057_v49, %v1056_v61  ;;  %v1064_v2 = vld [vmem:[#allocation3 + $0x22] sm:$0xff] }
 0x216   : > { %1931 = vrot.lane.b32.xlu0 %v1930_v48, %s2106_s22  ;;  %v1970_v9 = vpack.i.bf16 %v1064_v2, %v1040_v46  ;;  %v1955_v13 = vpack.i.bf16 %v1065_v59, %v1064_v2 }
 0x217   : > { %1941 = vrot.lane.b32.xlu1 %v1940_v51, %s2110_s11  ;;  %v1079_v51 = vld [vmem:[#allocation3 + $0x90] sm:$0xff] }
 0x21a   : > { %1961 = vrot.lane.b32.xlu0 %v1960_v58, %s2108_s28 }
 0x21b   : > { %1946 = vrot.lane.b32.xlu1 %v1945_v60, %s2111_s19  ;;  %v1087_v60 = vld [vmem:[#allocation3 + $0x91] sm:$0xff] }
 0x21e   : > { %v1721_v4 = vpop.f32.mrb[4].mxu0  ;;  %1966 = vrot.lane.b32.xlu0 %v1965_v63, %s2110_s11 }
 0x21f   : > { %v943_v6 = vadd.f32 %v1721_v4, %v2439_v20  ;;  %v934_v7 = vpop.f32.mrb[5].mxu0  ;;  %1951 = vrot.lane.b32.xlu1 %v1950_v1, %s2104_s18 }
 0x220   : > { %v935_v8 = vadd.f32 %v2439_v20, %v934_v7  ;;  %v1722_v53 = vpop.f32.mrb[6].mxu0 }
 0x221   : > { %v955_v10 = vmax.f32 %v943_v6, 0.0  ;;  %v946_v11 = vadd.f32 %v1722_v53, %v2439_v20  ;;  %v937_v12 = vpop.f32.mrb[7].mxu0 }
 0x222   : > { %v953_v15 = vmax.f32 %v935_v8, 0.0  ;;  %v938_v17 = vadd.f32 %v2439_v20, %v937_v12  ;;  %1971 = vrot.lane.b32.xlu0 %v1970_v9, %s2111_s19  ;;  %v1023_v12 = vld [vmem:[#allocation3] sm:$0xff] }
 0x223   : > { %v970_v56 = vmul.f32 %v2445_v25, %v955_v10  ;;  %v956_v18 = vmax.f32 %v946_v11, 0.0  ;;  %1956 = vrot.lane.b32.xlu1 %v1955_v13, %s2106_s22 }
 0x224   : > { %v968_v50 = vmul.f32 %v2445_v25, %v953_v15  ;;  %v954_v19 = vmax.f32 %v938_v17, 0.0 }
 0x225   : > { %v985_v23 = vadd.f32 %v2452_v30, %v970_v56  ;;  %v971_v24 = vmul.f32 %v2445_v25, %v956_v18 }
 0x226   : > { %v983_v20 = vadd.f32 %v2452_v30, %v968_v50  ;;  %v969_v26 = vmul.f32 %v2445_v25, %v954_v19  ;;  %1976 = vrot.lane.b32.xlu0 %v1975_v22, %s2112_s27  ;;  %v2092_v25 = vld [vmem:[%s2691_s5 + $0x20] ss:$0 sps:$4 sm:$0xff]  }
 0x227   : > { %1021 = vst.msk [vmem:[#allocation3 + $0x71] sm:$0xff] %vm773_vm3, %v985_v23  ;;  %v986_v27 = vadd.f32 %v2452_v30, %v971_v24  ;;  %1742 = vmatprep.subr.msk.bf16.mxu1 %vm1480_vm14, %v2092_v25  ;;  %v1482_v29 = vsel %vm1480_vm14, %v2092_v25, 0 }
 0x228   : > { %1019 = vst.msk [vmem:[#allocation3 + $0x51] sm:$0xff] %vm773_vm3, %v983_v20  ;;  %v984_v0 = vadd.f32 %v2452_v30, %v969_v26  ;;  %1732 = vmatpush3.bf16.msra.mxu1 %v1482_v29 }
 0x229   : > { %1022 = vst.msk [vmem:[#allocation3 + $0x81] sm:$0xff] %vm773_vm3, %v986_v27 }
 0x22a   : > { %1020 = vst.msk [vmem:[#allocation3 + $0x61] sm:$0xff] %vm773_vm3, %v984_v0  ;;  %1981 = vrot.lane.b32.xlu0 %v1950_v1, %s2113_s13 }
 0x22e   : > { %1986 = vrot.lane.b32.xlu0 %v1955_v13, %s2114_s16  ;;  %v2547_v38 = vld [vmem:[#allocation3 + $0x70] sm:$0xff] }
 0x22f   : > { %v2531_v30 = vld [vmem:[#allocation3 + $0x50] sm:$0xff] }
 0x230   : > { %v1091_v57 = vld [vmem:[#allocation3 + $0x52] sm:$0xff]  ;;  %v1990_v5 = vpack.i.bf16 %v2531_v30, %v2469_v43  ;;  %v1054_v36 = vld [vmem:[#allocation3 + $0x80] sm:$0xff] }
 0x231   : > { %v2005_v31 = vpack.i.bf16 %v1091_v57, %v2481_v54  ;;  %v1083_v32 = vld [vmem:[#allocation3 + $0x51] sm:$0xff]  ;;  %v2539_v34 = vld [vmem:[#allocation3 + $0x60] sm:$0xff]  ;;  %v2015_v16 = vpack.i.bf16 %v1054_v36, %v2547_v38  ;;  %v2030_v54 = vpack.i.bf16 %v1079_v51, %v1054_v36 }
 0x232   : > { %1991 = vrot.lane.b32.xlu1 %v1990_v5, %s2112_s27  ;;  %v1995_v33 = vpack.i.bf16 %v1083_v32, %v2474_v47  ;;  %v2050_v35 = vpack.i.bf16 %v2539_v34, %v2531_v30  ;;  %v1060_v37 = vld [vmem:[#allocation3 + $0x61] sm:$0xff]  ;;  %v1061_v41 = vld [vmem:[#allocation3 + $0x71] sm:$0xff]  ;;  %v2065_v49 = vpack.i.bf16 %v2547_v38, %v2539_v34 }
 0x233   : > { %2006 = vrot.lane.b32.xlu0 %v2005_v31, %s2114_s16  ;;  %v2055_v21 = vpack.i.bf16 %v1060_v37, %v1083_v32  ;;  %v1062_v39 = vld [vmem:[#allocation3 + $0x81] sm:$0xff]  ;;  %v1069_v47 = vld [vmem:[#allocation3 + $0x72] sm:$0xff]  ;;  %v2070_v58 = vpack.i.bf16 %v1061_v41, %v1060_v37 }
 0x234   : > { %v1068_v40 = vld [vmem:[#allocation3 + $0x62] sm:$0xff]  ;;  %v2020_v44 = vpack.i.bf16 %v1062_v39, %v1061_v41  ;;  %v2045_v61 = vpack.i.bf16 %v1087_v60, %v1062_v39 }
 0x235   : > { %v2060_v45 = vpack.i.bf16 %v1068_v40, %v1091_v57  ;;  %v1070_v46 = vld [vmem:[#allocation3 + $0x82] sm:$0xff]  ;;  %v2075_v59 = vpack.i.bf16 %v1069_v47, %v1068_v40 }
 0x236   : > { %1996 = vrot.lane.b32.xlu1 %v1995_v33, %s2113_s13  ;;  %v2025_v48 = vpack.i.bf16 %v1070_v46, %v1069_v47  ;;  %v2080_v63 = vpack.i.bf16 %v1095_v62, %v1070_v46 }
 0x237   : > { %2011 = vrot.lane.b32.xlu0 %v2005_v31, %s2106_s22 }
 0x23a   : > { %2001 = vrot.lane.b32.xlu1 %v1995_v33, %s2104_s18 }
 0x23b   : > { %2051 = vrot.lane.b32.xlu0 %v2050_v35, %s2108_s28 }
 0x23e   : > { %2016 = vrot.lane.b32.xlu1 %v2015_v16, %s2108_s28 }
 0x23f   : > { %2056 = vrot.lane.b32.xlu0 %v2055_v21, %s2110_s11 }
 0x242   : > { %2021 = vrot.lane.b32.xlu1 %v2020_v44, %s2110_s11 }
 0x243   : > { %2061 = vrot.lane.b32.xlu0 %v2060_v45, %s2111_s19 }
 0x246   : > { %2026 = vrot.lane.b32.xlu1 %v2025_v48, %s2111_s19 }
 0x247   : > { %2066 = vrot.lane.b32.xlu0 %v2065_v49, %s2112_s27 }
 0x24a   : > { %2031 = vrot.lane.b32.xlu1 %v2030_v54, %s2112_s27 }
 0x24b   : > { %2071 = vrot.lane.b32.xlu0 %v2070_v58, %s2113_s13 }
 0x24e   : > { %2036 = vrot.lane.b32.xlu1 %v2070_v58, %s2104_s18 }
 0x24f   : > { %2076 = vrot.lane.b32.xlu0 %v2075_v59, %s2114_s16 }
 0x252   : > { %2041 = vrot.lane.b32.xlu1 %v2075_v59, %s2106_s22 }
 0x256   : > { %2046 = vrot.lane.b32.xlu1 %v2045_v61, %s2113_s13 }
 0x25a   : > { %2081 = vrot.lane.b32.xlu1 %v2080_v63, %s2114_s16 }
 0x284   : > { %v1927_v1 = vpop.permute.xlu0 %1926 }
 0x285   : > { %v1937_v2 = vpop.permute.xlu1 %1936  ;;  %v1929_v10 = vunpack.i.h.bf16 %v1927_v1  ;;  %v1928_v11 = vunpack.i.l.bf16 %v1927_v1 }
 0x286   : > { %v1939_v14 = vunpack.i.h.bf16 %v1937_v2  ;;  %v1938_v15 = vunpack.i.l.bf16 %v1937_v2 }
 0x287   : > { %v1352_v50 = vsel %vm773_vm3, %v1023_v12, %v1928_v11  ;;  %v1353_v19 = vsel %vm773_vm3, %v2484_v55, %v1929_v10 }
 0x288   : > { %v1932_v3 = vpop.permute.xlu0 %1931 }
 0x289   : > { %v2565_v4 = vpop.permute.xlu1 %1941  ;;  %v1934_v17 = vunpack.i.h.bf16 %v1932_v3  ;;  %v1933_v56 = vunpack.i.l.bf16 %v1932_v3 }
 0x28a   : > { %v1944_v62 = vunpack.i.h.bf16 %v2565_v4  ;;  %v1943_v63 = vunpack.i.l.bf16 %v2565_v4 }
 0x28b   : > { %v1360_v5 = vsel %vm791_vm6, %v1352_v50, %v1933_v56  ;;  %v1361_v31 = vsel %vm791_vm6, %v1353_v19, %v1934_v17 }
 0x28c   : > { %v1962_v6 = vpop.permute.xlu0 %1961 }
 0x28d   : > { %v2567_v7 = vpop.permute.xlu1 %1946  ;;  %v1964_v22 = vunpack.i.h.bf16 %v1962_v6  ;;  %v1963_v23 = vunpack.i.l.bf16 %v1962_v6 }
 0x28e   : > { %v1949_v10 = vunpack.i.h.bf16 %v2567_v7  ;;  %v1948_v11 = vunpack.i.l.bf16 %v2567_v7 }
 0x28f   : > { %v1368_v35 = vsel %vm809_vm8, %v1360_v5, %v1963_v23  ;;  %v1369_v55 = vsel %vm809_vm8, %v1361_v31, %v1964_v22 }
 0x290   : > { %v1967_v8 = vpop.permute.xlu0 %1966 }
 0x291   : > { %v1952_v53 = vpop.permute.xlu1 %1951  ;;  %v1969_v24 = vunpack.i.h.bf16 %v1967_v8  ;;  %v1968_v20 = vunpack.i.l.bf16 %v1967_v8 }
 0x292   : > { %v1954_v26 = vunpack.i.h.bf16 %v1952_v53  ;;  %v1953_v27 = vunpack.i.l.bf16 %v1952_v53 }
 0x293   : > { %v1376_v16 = vsel %vm827_vm10, %v1368_v35, %v1968_v20  ;;  %v1377_v21 = vsel %vm827_vm10, %v1369_v55, %v1969_v24 }
 0x294   : > { %v1972_v9 = vpop.permute.xlu0 %1971  ;;  %v1355_v39 = vsel %vm773_vm3, %v2467_v42, %v1954_v26  ;;  %v1354_v40 = vsel %vm773_vm3, %v2478_v52, %v1953_v27 }
 0x295   : > { %v1957_v18 = vpop.permute.xlu1 %1956  ;;  %v1974_v28 = vunpack.i.h.bf16 %v1972_v9  ;;  %v1973_v0 = vunpack.i.l.bf16 %v1972_v9 }
 0x296   : > { %v1959_v25 = vunpack.i.h.bf16 %v1957_v18  ;;  %v1958_v29 = vunpack.i.l.bf16 %v1957_v18 }
 0x297   : > { %v1385_v41 = vsel %vm1384_vm15, %v1376_v16, %v1973_v0  ;;  %v1386_v44 = vsel %vm1384_vm15, %v1377_v21, %v1974_v28 }
 0x298   : > { %v1977_v13 = vpop.permute.xlu0 %1976  ;;  %v1362_v45 = vsel %vm791_vm6, %v1354_v40, %v1958_v29  ;;  %v1363_v46 = vsel %vm791_vm6, %v1355_v39, %v1959_v25 }
 0x299   : > { %v1979_v32 = vunpack.i.h.bf16 %v1977_v13  ;;  %v1978_v33 = vunpack.i.l.bf16 %v1977_v13  ;;  %v1370_v52 = vsel %vm809_vm8, %v1362_v45, %v1938_v15  ;;  %v1371_v59 = vsel %vm809_vm8, %v1363_v46, %v1939_v14 }
 0x29a   : > { %v1378_v53 = vsel %vm827_vm10, %v1370_v52, %v1943_v63  ;;  %v1379_v9 = vsel %vm827_vm10, %v1371_v59, %v1944_v62 }
 0x29b   : > { %v1394_v48 = vsel %vm1393_vm0, %v1385_v41, %v1978_v33  ;;  %v1395_v49 = vsel %vm1393_vm0, %v1386_v44, %v1979_v32  ;;  %v1387_v14 = vsel %vm1384_vm15, %v1378_v53, %v1948_v11  ;;  %v1388_v4 = vsel %vm1384_vm15, %v1379_v9, %v1949_v10 }
 0x29c   : > { %v1982_v57 = vpop.permute.xlu0 %1981 }
 0x29d   : > { %v1984_v36 = vunpack.i.h.bf16 %v1982_v57  ;;  %v1983_v37 = vunpack.i.l.bf16 %v1982_v57 }
 0x29f   : > { %v1403_v42 = vsel %vm1402_vm1, %v1394_v48, %v1983_v37  ;;  %v1404_v58 = vsel %vm1402_vm1, %v1395_v49, %v1984_v36 }
 0x2a0   : > { %v1987_v47 = vpop.permute.xlu0 %1986 }
 0x2a1   : > { %v1989_v51 = vunpack.i.h.bf16 %v1987_v47  ;;  %v1988_v54 = vunpack.i.l.bf16 %v1987_v47 }
 0x2a3   : > { %v1412_v60 = vsel %vm1411_vm2, %v1403_v42, %v1988_v54  ;;  %v1413_v61 = vsel %vm1411_vm2, %v1404_v58, %v1989_v51 }
 0x2a4   : > { %v1992_v1 = vpop.permute.xlu1 %1991  ;;  %v1420_v3 = vpack.c.bf16 %v1413_v61, %v1412_v60 }
 0x2a5   : > { %v2007_v2 = vpop.permute.xlu0 %2006  ;;  %v1994_v6 = vunpack.i.h.bf16 %v1992_v1  ;;  %v1993_v8 = vunpack.i.l.bf16 %v1992_v1 }
 0x2a6   : > { %1733 = vmatprep.mubr.msk.bf16.mxu1 %vm1467_vm4, %v1420_v3  ;;  %v2009_v50 = vunpack.i.h.bf16 %v2007_v2  ;;  %v2008_v19 = vunpack.i.l.bf16 %v2007_v2 }
 0x2a7   : > { %v1396_v56 = vsel %vm1393_vm0, %v1387_v14, %v1993_v8  ;;  %v1397_v18 = vsel %vm1393_vm0, %v1388_v4, %v1994_v6 }
 0x2a8   : > { %v1997_v12 = vpop.permute.xlu1 %1996 }
 0x2a9   : > { %v2012_v13 = vpop.permute.xlu0 %2011  ;;  %v1999_v15 = vunpack.i.h.bf16 %v1997_v12  ;;  %v1998_v17 = vunpack.i.l.bf16 %v1997_v12 }
 0x2aa   : > { %v2014_v33 = vunpack.i.h.bf16 %v2012_v13  ;;  %v2013_v35 = vunpack.i.l.bf16 %v2012_v13 }
 0x2ab   : > { %v1405_v22 = vsel %vm1402_vm1, %v1396_v56, %v1998_v17  ;;  %v1406_v23 = vsel %vm1402_vm1, %v1397_v18, %v1999_v15 }
 0x2ac   : > { %v2002_v24 = vpop.permute.xlu1 %2001  ;;  %v1414_v20 = vsel %vm1411_vm2, %v1405_v22, %v2008_v19  ;;  %v1415_v26 = vsel %vm1411_vm2, %v1406_v23, %v2009_v50 }
 0x2ad   : > { %v2052_v7 = vpop.permute.xlu0 %2051  ;;  %v1421_v27 = vpack.c.bf16 %v1415_v26, %v1414_v20  ;;  %v2004_v25 = vunpack.i.h.bf16 %v2002_v24  ;;  %v2003_v29 = vunpack.i.l.bf16 %v2002_v24 }
 0x2ae   : > { %v2054_v21 = vunpack.i.h.bf16 %v2052_v7  ;;  %v2053_v39 = vunpack.i.l.bf16 %v2052_v7 }
 0x2af   : > { %1734 = vmatmul.mubr.msk.bf16.vlgmr.msra.gmra.mrb[0].mxu1 %vm1467_vm4, %v1421_v27  ;;  %v1357_v31 = vsel %vm773_vm3, %v2531_v30, %v2004_v25  ;;  %v1356_v32 = vsel %vm773_vm3, %v2469_v43, %v2003_v29 }
 0x2b0   : > { %v2017_v28 = vpop.permute.xlu1 %2016  ;;  %v1364_v37 = vsel %vm791_vm6, %v1356_v32, %v2013_v35  ;;  %v1365_v16 = vsel %vm791_vm6, %v1357_v31, %v2014_v33 }
 0x2b1   : > { %v2057_v0 = vpop.permute.xlu0 %2056  ;;  %v1372_v44 = vsel %vm809_vm8, %v1364_v37, %v2053_v39  ;;  %v1373_v45 = vsel %vm809_vm8, %v1365_v16, %v2054_v21  ;;  %v2019_v4 = vunpack.i.h.bf16 %v2017_v28  ;;  %v2018_v15 = vunpack.i.l.bf16 %v2017_v28  ;;  %v1677_v39 = vld [vmem:[%s2692_s6] ss:$0 sm:$0xff] }
 0x2b2   : > { %v2059_v40 = vunpack.i.h.bf16 %v2057_v0  ;;  %v2058_v41 = vunpack.i.l.bf16 %v2057_v0 }
 0x2b4   : > { %v2610_v57 = vpop.permute.xlu1 %2021  ;;  %v1380_v42 = vsel %vm827_vm10, %v1372_v44, %v2058_v41  ;;  %v1381_v58 = vsel %vm827_vm10, %v1373_v45, %v2059_v40  ;;  %v1687_v45 = vld [vmem:[%s2693_s7] ss:$0 sm:$0xff] }
 0x2b5   : > { %v2062_v5 = vpop.permute.xlu0 %2061  ;;  %v2024_v18 = vunpack.i.h.bf16 %v2610_v57  ;;  %v2023_v50 = vunpack.i.l.bf16 %v2610_v57 }
 0x2b6   : > { %v2064_v30 = vunpack.i.h.bf16 %v2062_v5  ;;  %v2063_v46 = vunpack.i.l.bf16 %v2062_v5 }
 0x2b8   : > { %v2027_v55 = vpop.permute.xlu1 %2026  ;;  %v1389_v52 = vsel %vm1384_vm15, %v1380_v42, %v2063_v46  ;;  %v1390_v59 = vsel %vm1384_vm15, %v1381_v58, %v2064_v30 }
 0x2b9   : > { %v2067_v36 = vpop.permute.xlu0 %2066  ;;  %v2029_v23 = vunpack.i.h.bf16 %v2027_v55  ;;  %v2028_v24 = vunpack.i.l.bf16 %v2027_v55 }
 0x2ba   : > { %v2069_v48 = vunpack.i.h.bf16 %v2067_v36  ;;  %v2068_v49 = vunpack.i.l.bf16 %v2067_v36 }
 0x2bc   : > { %v2032_v47 = vpop.permute.xlu1 %2031  ;;  %v1398_v62 = vsel %vm1393_vm0, %v1389_v52, %v2068_v49  ;;  %v1399_v63 = vsel %vm1393_vm0, %v1390_v59, %v2069_v48  ;;  %v1688_v49 = vld [vmem:[%s2694_s8] ss:$0 sm:$0xff] }
 0x2bd   : > { %v2072_v43 = vpop.permute.xlu0 %2071  ;;  %v2034_v26 = vunpack.i.h.bf16 %v2032_v47  ;;  %v2033_v27 = vunpack.i.l.bf16 %v2032_v47 }
 0x2be   : > { %v2074_v51 = vunpack.i.h.bf16 %v2072_v43  ;;  %v2073_v54 = vunpack.i.l.bf16 %v2072_v43 }
 0x2c0   : > { %v2037_v60 = vpop.permute.xlu1 %2036  ;;  %v1407_v3 = vsel %vm1402_vm1, %v1398_v62, %v2073_v54  ;;  %v1408_v6 = vsel %vm1402_vm1, %v1399_v63, %v2074_v51 }
 0x2c1   : > { %v2077_v61 = vpop.permute.xlu0 %2076  ;;  %v2039_v8 = vunpack.i.h.bf16 %v2037_v60  ;;  %v2038_v53 = vunpack.i.l.bf16 %v2037_v60 }
 0x2c2   : > { %v2079_v1 = vunpack.i.h.bf16 %v2077_v61  ;;  %v2078_v2 = vunpack.i.l.bf16 %v2077_v61 }
 0x2c3   : > { %v1359_v17 = vsel %vm773_vm3, %v2547_v38, %v2039_v8  ;;  %v1358_v56 = vsel %vm773_vm3, %v2539_v34, %v2038_v53 }
 0x2c4   : > { %v1416_v9 = vsel %vm1411_vm2, %v1407_v3, %v2078_v2  ;;  %v1417_v10 = vsel %vm1411_vm2, %v1408_v6, %v2079_v1  ;;  %v2042_v12 = vpop.permute.xlu1 %2041 }
 0x2c5   : > { %v1422_v11 = vpack.c.bf16 %v1417_v10, %v1416_v9  ;;  %v2044_v13 = vunpack.i.h.bf16 %v2042_v12  ;;  %v2043_v14 = vunpack.i.l.bf16 %v2042_v12 }
 0x2c7   : > { %1737 = vmatprep.mubr.msk.bf16.mxu1 %vm1467_vm4, %v1422_v11  ;;  %v1366_v19 = vsel %vm791_vm6, %v1358_v56, %v2043_v14  ;;  %v1367_v22 = vsel %vm791_vm6, %v1359_v17, %v2044_v13 }
 0x2c8   : > { %v1374_v7 = vsel %vm809_vm8, %v1366_v19, %v2018_v15  ;;  %v1375_v20 = vsel %vm809_vm8, %v1367_v22, %v2019_v4  ;;  %v2047_v38 = vpop.permute.xlu1 %2046 }
 0x2c9   : > { %v1382_v34 = vsel %vm827_vm10, %v1374_v7, %v2023_v50  ;;  %v1383_v28 = vsel %vm827_vm10, %v1375_v20, %v2024_v18  ;;  %v2049_v0 = vunpack.i.h.bf16 %v2047_v38  ;;  %v2048_v25 = vunpack.i.l.bf16 %v2047_v38 }
 0x2ca   : > { %v1391_v29 = vsel %vm1384_vm15, %v1382_v34, %v2028_v24  ;;  %v1392_v57 = vsel %vm1384_vm15, %v1383_v28, %v2029_v23 }
 0x2cb   : > { %v1400_v5 = vsel %vm1393_vm0, %v1391_v29, %v2033_v27  ;;  %v1401_v31 = vsel %vm1393_vm0, %v1392_v57, %v2034_v26 }
 0x2cc   : > { %v2082_v32 = vpop.permute.xlu1 %2081  ;;  %v1409_v55 = vsel %vm1402_vm1, %v1400_v5, %v2048_v25  ;;  %v1410_v36 = vsel %vm1402_vm1, %v1401_v31, %v2049_v0 }
 0x2cd   : > { %v2084_v33 = vunpack.i.h.bf16 %v2082_v32  ;;  %v2083_v35 = vunpack.i.l.bf16 %v2082_v32 }
 0x2cf   : > { %v1418_v37 = vsel %vm1411_vm2, %v1409_v55, %v2083_v35  ;;  %v1419_v16 = vsel %vm1411_vm2, %v1410_v36, %v2084_v33 }
 0x2d0   : > { %v1423_v21 = vpack.c.bf16 %v1419_v16, %v1418_v37 }
 0x2d2   : > { %1738 = vmatmul.mubr.msk.bf16.gmra.mrb[4].mxu1 %vm1467_vm4, %v1423_v21 }
 0x382   : > { %v1735_v40 = vpop.f32.mrb[0].mxu1 }
 0x383   : > { %v1527_v41 = vadd.f32 %v1735_v40, %v1677_v39  ;;  %v1518_v44 = vpop.f32.mrb[1].mxu1 }
 0x384   : > { %v1519_v30 = vadd.f32 %v1677_v39, %v1518_v44  ;;  %v1736_v46 = vpop.f32.mrb[2].mxu1 }
 0x385   : > { %v1551_v47 = vmax.f32 %v1527_v41, 0.0  ;;  %v1530_v43 = vadd.f32 %v1736_v46, %v1677_v39  ;;  %v1521_v48 = vpop.f32.mrb[3].mxu1 }
 0x386   : > { %v1549_v51 = vmax.f32 %v1519_v30, 0.0  ;;  %v1522_v54 = vadd.f32 %v1677_v39, %v1521_v48 }
 0x387   : > { %v1566_v42 = vmul.f32 %v1687_v45, %v1551_v47  ;;  %v1552_v58 = vmax.f32 %v1530_v43, 0.0 }
 0x388   : > { %v1564_v52 = vmul.f32 %v1687_v45, %v1549_v51  ;;  %v1550_v59 = vmax.f32 %v1522_v54, 0.0 }
 0x389   : > { %v1581_v60 = vadd.f32 %v1688_v49, %v1566_v42  ;;  %v1567_v61 = vmul.f32 %v1687_v45, %v1552_v58 }
 0x38a   : > { %v1579_v62 = vadd.f32 %v1688_v49, %v1564_v52  ;;  %v1565_v63 = vmul.f32 %v1687_v45, %v1550_v59 }
 0x38b   : > { %1589 = vst.msk [vmem:[%s2665_s24 + $0x10] sm:$0xff] %vm773_vm3, %v1581_v60  ;;  %v1582_v1 = vadd.f32 %v1688_v49, %v1567_v61 }
 0x38c   : > { %1587 = vst.msk [vmem:[%s2665_s24] sm:$0xff] %vm773_vm3, %v1579_v62  ;;  %v1580_v2 = vadd.f32 %v1688_v49, %v1565_v63 }
 0x38d   : > { %1590 = vst.msk [vmem:[%s2665_s24 + $0x18] sm:$0xff] %vm773_vm3, %v1582_v1 }
 0x38e   : > { %1588 = vst.msk [vmem:[%s2665_s24 + $0x8] sm:$0xff] %vm773_vm3, %v1580_v2 }
 0x3a5   : > { %v1739_v3 = vpop.f32.mrb[4].mxu1 }
 0x3a6   : > { %v1543_v6 = vadd.f32 %v1739_v3, %v1677_v39  ;;  %v1534_v8 = vpop.f32.mrb[5].mxu1 }
 0x3a7   : > { %v1535_v53 = vadd.f32 %v1677_v39, %v1534_v8  ;;  %v1740_v9 = vpop.f32.mrb[6].mxu1 }
 0x3a8   : > { %v1555_v10 = vmax.f32 %v1543_v6, 0.0  ;;  %v1546_v11 = vadd.f32 %v1740_v9, %v1677_v39  ;;  %v1537_v12 = vpop.f32.mrb[7].mxu1 }
 0x3a9   : > { %v1553_v13 = vmax.f32 %v1535_v53, 0.0  ;;  %v1538_v14 = vadd.f32 %v1677_v39, %v1537_v12 }
 0x3aa   : > { %v1570_v4 = vmul.f32 %v1687_v45, %v1555_v10  ;;  %v1556_v15 = vmax.f32 %v1546_v11, 0.0 }
 0x3ab   : > { %v1568_v17 = vmul.f32 %v1687_v45, %v1553_v13  ;;  %v1554_v56 = vmax.f32 %v1538_v14, 0.0 }
 0x3ac   : > { %v1585_v18 = vadd.f32 %v1688_v49, %v1570_v4  ;;  %v1571_v50 = vmul.f32 %v1687_v45, %v1556_v15 }
 0x3ad   : > { %v1583_v19 = vadd.f32 %v1688_v49, %v1568_v17  ;;  %v1569_v22 = vmul.f32 %v1687_v45, %v1554_v56 }
 0x3ae   : > { %1593 = vst.msk [vmem:[%s2665_s24 + $0x30] sm:$0xff] %vm773_vm3, %v1585_v18  ;;  %v1586_v23 = vadd.f32 %v1688_v49, %v1571_v50 }
 0x3af   : > { %1591 = vst.msk [vmem:[%s2665_s24 + $0x20] sm:$0xff] %vm773_vm3, %v1583_v19  ;;  %v1584_v24 = vadd.f32 %v1688_v49, %v1569_v22 }
 0x3b0   : > { %1594 = vst.msk [vmem:[%s2665_s24 + $0x38] sm:$0xff] %vm773_vm3, %v1586_v23 }
 0x3b1   : > { %1592 = vst.msk [vmem:[%s2665_s24 + $0x28] sm:$0xff] %vm773_vm3, %v1584_v24 }
 0x3b2 PF: > { %s19_s30 = sadd.s32 1, %s2099_s30  }
 0x3b3   : > { %p16_p4 = scmp.ge.s32.totalorder %s19_s30, 4  }
 0x3b5   :  { %18 = sbr.rel (!%p16_p4) target bundleno = 1 (0x1), region = 93 }

</bundles_post_ra>
